<compile_context>
chip_gen: v7x
topology: tpu7x:2x2x1
jax: 0.10.0
libtpu: 0.0.40
codegen_flags: <defaults>
</compile_context>

<pallas_src>
import functools

import numpy as np
import jax
import jax.numpy as jnp
from jax import lax
from jax.experimental import pallas as pl
from jax.experimental.pallas import tpu as pltpu

GRID_S = 7
GRID_B = 2
NUM_CLASSES = 20
DIM = 5 * GRID_B + NUM_CLASSES  # 30
LAMBDA_COORD = 5.0
LAMBDA_NOOBJ = 0.5


def _yolo_loss_kernel(pred_ref, label_ref, out_ref, acc_ref, *, chunks, inv_batch):
    """Grid = (num_splits, tiles_per_split).

    pred_ref / label_ref : (DIM, rows, 128) block -- channels on the leading
        (untiled) axis, grid cells dense on (sublane, lane).
    out_ref  : (1, 1, 128) per-split result row (lanes 0..4 hold the outputs).
    acc_ref  : (4, rows, 128) f32 accumulator, resident across the t axis.
    """
    t = pl.program_id(1)

    @pl.when(t == 0)
    def _init():
        acc_ref[...] = jnp.zeros_like(acc_ref)

    S = jnp.float32(GRID_S)
    zero = jnp.float32(0.0)

    def iou_fn(cxp, cyp, wp, hp, cxl, cyl, wl, hl):
        # The reference adds the same per-cell (i, j) offset to both the pred
        # and label centers of each compared pair -> translation cancels; only
        # the /S scaling on the centers (already applied by the caller) stays.
        px0 = cxp - 0.5 * wp; py0 = cyp - 0.5 * hp
        pX = cxp + 0.5 * wp;  pY = cyp + 0.5 * hp
        lx0 = cxl - 0.5 * wl; ly0 = cyl - 0.5 * hl
        lX = cxl + 0.5 * wl;  lY = cyl + 0.5 * hl
        no_ov = (pX < lx0) | (px0 > lX) | (pY < ly0) | (py0 > lY)
        ov = jnp.logical_not(no_ov).astype(jnp.float32)
        ix0 = jnp.maximum(px0, lx0); iy0 = jnp.maximum(py0, ly0)
        ix1 = jnp.minimum(pX, lX);   iy1 = jnp.minimum(pY, lY)
        parea = (pX - px0) * (pY - py0)
        larea = (lX - lx0) * (lY - ly0)
        iarea = (ix1 - ix0) * (iy1 - iy0) * ov
        return iarea / (parea + larea - iarea)     # exact divide (see header)

    for r0, rs in chunks:                          # static, few unrolled chunks
        sl = slice(r0, r0 + rs)

        def rd(ref, c, _sl=sl):
            return ref[c, _sl, :].astype(jnp.float32)      # (rs, 128), dense

        obj = rd(label_ref, 0) == 1.0              # cells containing an object

        pc1, px1, py1, pw1, ph1 = (rd(pred_ref, c) for c in range(0, 5))
        pc2, px2, py2, pw2, ph2 = (rd(pred_ref, c) for c in range(5, 10))
        lx1, ly1, lw1, lh1 = (rd(label_ref, c) for c in range(1, 5))
        lx2, ly2, lw2, lh2 = (rd(label_ref, c) for c in range(6, 10))

        iou1 = iou_fn(px1 / S, py1 / S, pw1, ph1, lx1 / S, ly1 / S, lw1, lh1)
        iou2 = iou_fn(px2 / S, py2 / S, pw2, ph2, lx2 / S, ly2 / S, lw2, lh2)

        sel1 = iou1 >= iou2                        # ties -> box 0 (torch argmax)
        pick = lambda a, b: jnp.where(sel1, a, b)

        conf_p = pick(pc1, pc2)
        iou_s = pick(iou1, iou2)
        x_p, y_p = pick(px1, px2), pick(py1, py2)
        w_p, h_p = pick(pw1, pw2), pick(ph1, ph2)
        x_l, y_l = pick(lx1, lx2), pick(ly1, ly2)
        w_l, h_l = pick(lw1, lw2), pick(lh1, lh2)

        # mask before sqrt so non-object / padded cells cannot leak NaN
        sw_p = jnp.sqrt(jnp.where(obj, w_p, zero))
        sh_p = jnp.sqrt(jnp.where(obj, h_p, zero))
        sw_l = jnp.sqrt(jnp.where(obj, w_l, zero))
        sh_l = jnp.sqrt(jnp.where(obj, h_l, zero))

        conf_term = jnp.where(obj, (iou_s - conf_p) ** 2, zero)
        coord_term = jnp.where(
            obj,
            (x_l - x_p) ** 2 + (y_l - y_p) ** 2
            + (sw_l - sw_p) ** 2 + (sh_l - sh_p) ** 2,
            zero)

        # class loss: lazy per-channel reads keep the live vreg set tiny
        cls_sum = jnp.zeros((rs, 128), jnp.float32)
        for c in range(10, DIM):
            dlt = rd(label_ref, c) - rd(pred_ref, c)
            cls_sum = cls_sum + dlt * dlt
        cls_term = jnp.where(obj, cls_sum, zero)

        # non-responsible box of object cells + both boxes of empty cells
        conf_non = jnp.where(sel1, pc2, pc1)
        iou_non = jnp.where(sel1, iou2, iou1)
        noobj_term = (jnp.where(obj, (iou_non - conf_non) ** 2, zero)
                      + jnp.where(obj, zero, pc1 * pc1 + pc2 * pc2))

        # deferred reduction: elementwise accumulate, reduce once at finalize
        acc_ref[0, sl, :] += conf_term
        acc_ref[1, sl, :] += coord_term
        acc_ref[2, sl, :] += cls_term
        acc_ref[3, sl, :] += noobj_term

    @pl.when(t == pl.num_programs(1) - 1)
    def _finalize():
        def total(k):                                   # (rows, 128) -> (1, 1)
            part = jnp.sum(acc_ref[k], axis=1, keepdims=True)
            return jnp.sum(part, axis=0, keepdims=True)

        conf = total(0)
        coord = jnp.float32(LAMBDA_COORD) * total(1)
        cls = total(2)
        noobj = jnp.float32(LAMBDA_NOOBJ) * total(3)
        loss = conf + coord + cls + noobj
        lane = lax.broadcasted_iota(jnp.int32, (1, 128), 1)
        row = (jnp.where(lane == 0, loss, zero)
               + jnp.where(lane == 1, cls, zero)
               + jnp.where(lane == 2, conf, zero)
               + jnp.where(lane == 3, coord, zero)
               + jnp.where(lane == 4, noobj, zero))
        out_ref[0] = row * jnp.float32(inv_batch)


def _cdiv(a, b):
    return -(-a // b)


def _round_up(x, m):
    return _cdiv(x, m) * m


def _default_num_splits():
    """Grid-splittable TensorCores: 2 on v7x, 1 on v5e/v6e (and unknowns)."""
    try:
        kind = jax.devices()[0].device_kind.lower()
    except Exception:
        return 1
    return 2 if "v7" in kind else 1


def yolo_v1_loss(predict, labels, *, num_splits=None, max_block_rows=64,
                 input_dtype=None):
    """Returns (loss, obj_class, obj_conf, obj_coord, noobj), each / batch."""
    batch, s0, s1, d = predict.shape
    assert s0 == GRID_S and s1 == GRID_S and d == DIM
    n = batch * GRID_S * GRID_S

    if num_splits is None:
        num_splits = _default_num_splits()

    # Cell-axis tiling for the (DIM, R_pad, 128) channel-major layout.
    R = _cdiv(n, 128)
    if num_splits == 1 and R <= max_block_rows:
        rows_per_block, tiles_per_split = R, 1          # zero row padding
    else:
        r_split = _cdiv(R, num_splits)
        tiles_per_split = max(1, _cdiv(r_split, max_block_rows))
        rows_per_block = _round_up(_cdiv(r_split, tiles_per_split), 8)
        tiles_per_split = _cdiv(r_split, rows_per_block)
    R_pad = num_splits * tiles_per_split * rows_per_block
    n_pad = R_pad * 128

    store_dtype = jnp.dtype(input_dtype) if input_dtype is not None else predict.dtype

    def to_blocks(x):
        # (batch,S,S,DIM) -> (DIM, R_pad, 128); pad fused into the relayout.
        # Zero padding keeps obj mask False / padded confidences 0 -> zero loss.
        # TODO(synk): the channel-major transpose still costs one extra HBM
        # read+write per input; only a channel-major producer removes it.
        x = x.reshape(n, d).astype(store_dtype)
        x = jnp.pad(x, ((0, n_pad - n), (0, 0)))
        return jnp.transpose(x.reshape(R_pad, 128, d), (2, 0, 1))

    pred_b = to_blocks(predict)
    lab_b = to_blocks(labels)

    # Inner compute chunks of <=8 rows: each per-channel slice is ~1 vreg, so
    # the chunk body fits in registers (no spills) regardless of block size.
    chunks, r0 = [], 0
    while r0 < rows_per_block:
        rs = min(8, rows_per_block - r0)
        chunks.append((r0, rs))
        r0 += rs

    kernel = functools.partial(_yolo_loss_kernel, chunks=tuple(chunks),
                               inv_batch=1.0 / batch)
    tps = tiles_per_split
    out = pl.pallas_call(
        kernel,
        out_shape=jax.ShapeDtypeStruct((num_splits, 1, 128), jnp.float32),
        grid=(num_splits, tiles_per_split),
        in_specs=[
            pl.BlockSpec((DIM, rows_per_block, 128),
                         lambda p, t: (0, p * tps + t, 0)),
            pl.BlockSpec((DIM, rows_per_block, 128),
                         lambda p, t: (0, p * tps + t, 0)),
        ],
        out_specs=pl.BlockSpec((1, 1, 128), lambda p, t: (p, 0, 0)),
        scratch_shapes=[pltpu.VMEM((4, rows_per_block, 128), jnp.float32)],
        compiler_params=pltpu.CompilerParams(
            dimension_semantics=("parallel", "arbitrary")),
    )(pred_b, lab_b)

    total = jnp.sum(out, axis=0)[0]                     # (128,)
    return total[0], total[1], total[2], total[3], total[4]


def ref_loss_np(predict, labels):
    """Pure numpy reference mirroring the PyTorch module exactly."""
    predict = predict.astype(np.float64)
    labels = labels.astype(np.float64)
    B, S, _, _ = predict.shape
    cover = np.broadcast_to(np.arange(S, dtype=np.float64)[None, None, :], (B, S, S))
    coverx = np.broadcast_to(np.arange(S, dtype=np.float64)[None, :, None], (B, S, S))
    pc = predict.copy(); lc = labels.copy()
    for t in (pc, lc):
        t[..., 1] = (t[..., 1] + cover) / S
        t[..., 6] = (t[..., 6] + cover) / S
        t[..., 2] = (t[..., 2] + coverx) / S
        t[..., 7] = (t[..., 7] + coverx) / S
    mask = labels[..., 0] == 1.0
    obj_i_pred = pc[mask]
    obj_i_label = lc[mask]
    obj_bbox_pred = obj_i_pred[:, :10].reshape(-1, 2, 5)
    obj_bbox_label = obj_i_label[:, :10].reshape(-1, 2, 5)

    def corners(c):
        out = np.zeros_like(c)
        out[..., 0] = c[..., 0] - 0.5 * c[..., 2]
        out[..., 1] = c[..., 1] - 0.5 * c[..., 3]
        out[..., 2] = c[..., 0] + 0.5 * c[..., 2]
        out[..., 3] = c[..., 1] + 0.5 * c[..., 3]
        return out

    pb = corners(obj_bbox_pred[:, :, 1:5])
    lb = corners(obj_bbox_label[:, :, 1:5])
    no_ov = ((pb[..., 2] < lb[..., 0]) | (pb[..., 0] > lb[..., 2]) |
             (pb[..., 3] < lb[..., 1]) | (pb[..., 1] > lb[..., 3]))
    ov = ~no_ov
    parea = (pb[..., 2] - pb[..., 0]) * (pb[..., 3] - pb[..., 1])
    larea = (lb[..., 2] - lb[..., 0]) * (lb[..., 3] - lb[..., 1])
    ix0 = np.maximum(pb[..., 0], lb[..., 0]); iy0 = np.maximum(pb[..., 1], lb[..., 1])
    ix1 = np.minimum(pb[..., 2], lb[..., 2]); iy1 = np.minimum(pb[..., 3], lb[..., 3])
    iarea = (ix1 - ix0) * (iy1 - iy0) * ov
    iou = iarea / (parea + larea - iarea)
    sel = np.zeros_like(iou, dtype=bool)
    if iou.shape[0]:
        sel[np.arange(iou.shape[0]), iou.argmax(axis=1)] = True

    nc_pred = predict[mask][:, :10].reshape(-1, 2, 5)
    nc_label = labels[mask][:, :10].reshape(-1, 2, 5)
    true_label = np.concatenate([iou[..., None], nc_label[:, :, 1:]], axis=2)
    sel3 = np.broadcast_to(sel[..., None], nc_pred.shape)
    obj_ij_pred = nc_pred[sel3].reshape(-1, 5).copy()
    obj_ij_label = true_label[sel3].reshape(-1, 5).copy()
    obj_ij_pred[:, 3:5] = np.sqrt(obj_ij_pred[:, 3:5])
    obj_ij_label[:, 3:5] = np.sqrt(obj_ij_label[:, 3:5])
    obj_ij_pred = np.concatenate([obj_ij_pred, obj_i_pred[:, 10:]], axis=1)
    obj_ij_label = np.concatenate([obj_ij_label, obj_i_label[:, 10:]], axis=1)
    comp = ((obj_ij_label - obj_ij_pred) ** 2).sum(axis=0)
    obj_class = comp[5:].sum()
    obj_conf = comp[0]
    obj_coord = LAMBDA_COORD * comp[1:5].sum()
    obj_loss = obj_class + obj_conf + obj_coord
    nosel3 = ~sel3
    no_pred = obj_bbox_pred[nosel3].reshape(-1, 5)[:, 0]
    no_label = true_label[nosel3].reshape(-1, 5)[:, 0]
    noobj1 = LAMBDA_NOOBJ * ((no_label - no_pred) ** 2).sum()
    noobj_i_pred = pc[~mask]
    noobj0 = LAMBDA_NOOBJ * (noobj_i_pred[:, 0] ** 2 + noobj_i_pred[:, 5] ** 2).sum()
    noobj = noobj1 + noobj0
    loss = obj_loss + noobj
    return (loss / B, obj_class / B, obj_conf / B, obj_coord / B, noobj / B)


if __name__ == "__main__":
    batch = 2
    key = jax.random.PRNGKey(0)
    k1, k2, k3 = jax.random.split(key, 3)

    # predictions: positive (sqrt of w,h is taken on selected boxes, as in YOLO)
    predict = jax.random.uniform(k1, (batch, GRID_S, GRID_S, DIM),
                                 dtype=jnp.float32, minval=0.01, maxval=0.99)
    # labels: channel 0 is exact {0,1} objectness; box params positive
    obj_mask = jax.random.bernoulli(k2, 0.3, (batch, GRID_S, GRID_S)).astype(jnp.float32)
    labels = jax.random.uniform(k3, (batch, GRID_S, GRID_S, DIM),
                                dtype=jnp.float32, minval=0.05, maxval=0.95)
    labels = labels.at[..., 0].set(obj_mask)

    outs = yolo_v1_loss(predict, labels)
    outs = jax.block_until_ready(outs)

    ref = ref_loss_np(np.asarray(predict), np.asarray(labels))
    for got, want in zip(outs, ref):
        assert np.allclose(np.float64(got), want, rtol=1e-3, atol=1e-4), (float(got), float(want))

    print("KERNEL_OK")
</pallas_src>

<mosaic_0001>
module attributes {stable_mosaic.version = 11 : i64} {
  func.func @_yolo_loss_kernel(%arg0: i32, %arg1: i32, %arg2: memref<30x1x128xf32, #tpu.memory_space<vmem>>, %arg3: memref<30x1x128xf32, #tpu.memory_space<vmem>>, %arg4: memref<1x1x128xf32, #tpu.memory_space<vmem>>, %arg5: memref<4x1x128xf32, #tpu.memory_space<vmem>>) attributes {dimension_semantics = [#tpu.dimension_semantics<parallel>, #tpu.dimension_semantics<arbitrary>], iteration_bounds = array<i64: 1, 1>, scalar_prefetch = 0 : i64, scratch_operands = 1 : i64, tpu.core_type = #tpu.core_type<tc>, window_params = [{transform_indices = @transform_0, window_bounds = array<i64: 30, 1, 128>}, {transform_indices = @transform_1, window_bounds = array<i64: 30, 1, 128>}, {transform_indices = @transform_2, window_bounds = array<i64: 1, 1, 128>}]} {
    %c0_i32 = arith.constant 0 : i32
    %0 = arith.cmpi eq, %arg1, %c0_i32 : i32
    %1 = arith.extui %0 : i1 to i32
    %c0_i32_0 = arith.constant 0 : i32
    %2 = arith.cmpi ne, %1, %c0_i32_0 : i32
    scf.if %2 {
      %cst_211 = arith.constant 0.000000e+00 : f32
      %383 = vector.broadcast %cst_211 : f32 to vector<4x1x128xf32>
      %c0_212 = arith.constant 0 : index
      %c0_213 = arith.constant 0 : index
      %c0_214 = arith.constant 0 : index
      %384 = vector.load %arg5[%c0_212, %c0_213, %c0_214] : memref<4x1x128xf32, #tpu.memory_space<vmem>>, vector<4x1x128xf32>
      tpu.vector_store %arg5[%c0_212, %c0_213, %c0_214], %383 {strides = array<i32>} : memref<4x1x128xf32, #tpu.memory_space<vmem>>, vector<4x1x128xf32>,
    } else {
    }
    %c0 = arith.constant 0 : index
    %c0_1 = arith.constant 0 : index
    %c0_2 = arith.constant 0 : index
    %3 = vector.load %arg3[%c0, %c0_1, %c0_2] : memref<30x1x128xf32, #tpu.memory_space<vmem>>, vector<1x1x128xf32>
    %4 = vector.shape_cast %3 : vector<1x1x128xf32> to vector<1x128xf32>
    %cst = arith.constant 1.000000e+00 : f32
    %5 = vector.broadcast %cst : f32 to vector<1x128xf32>
    %6 = arith.cmpf oeq, %4, %5 : vector<1x128xf32>
    %c0_3 = arith.constant 0 : index
    %c0_4 = arith.constant 0 : index
    %c0_5 = arith.constant 0 : index
    %7 = vector.load %arg2[%c0_3, %c0_4, %c0_5] : memref<30x1x128xf32, #tpu.memory_space<vmem>>, vector<1x1x128xf32>
    %8 = vector.shape_cast %7 : vector<1x1x128xf32> to vector<1x128xf32>
    %c1 = arith.constant 1 : index
    %c0_6 = arith.constant 0 : index
    %c0_7 = arith.constant 0 : index
    %9 = vector.load %arg2[%c1, %c0_6, %c0_7] : memref<30x1x128xf32, #tpu.memory_space<vmem>>, vector<1x1x128xf32>
    %10 = vector.shape_cast %9 : vector<1x1x128xf32> to vector<1x128xf32>
    %c2 = arith.constant 2 : index
    %c0_8 = arith.constant 0 : index
    %c0_9 = arith.constant 0 : index
    %11 = vector.load %arg2[%c2, %c0_8, %c0_9] : memref<30x1x128xf32, #tpu.memory_space<vmem>>, vector<1x1x128xf32>
    %12 = vector.shape_cast %11 : vector<1x1x128xf32> to vector<1x128xf32>
    %c3 = arith.constant 3 : index
    %c0_10 = arith.constant 0 : index
    %c0_11 = arith.constant 0 : index
    %13 = vector.load %arg2[%c3, %c0_10, %c0_11] : memref<30x1x128xf32, #tpu.memory_space<vmem>>, vector<1x1x128xf32>
    %14 = vector.shape_cast %13 : vector<1x1x128xf32> to vector<1x128xf32>
    %c4 = arith.constant 4 : index
    %c0_12 = arith.constant 0 : index
    %c0_13 = arith.constant 0 : index
    %15 = vector.load %arg2[%c4, %c0_12, %c0_13] : memref<30x1x128xf32, #tpu.memory_space<vmem>>, vector<1x1x128xf32>
    %16 = vector.shape_cast %15 : vector<1x1x128xf32> to vector<1x128xf32>
    %c5 = arith.constant 5 : index
    %c0_14 = arith.constant 0 : index
    %c0_15 = arith.constant 0 : index
    %17 = vector.load %arg2[%c5, %c0_14, %c0_15] : memref<30x1x128xf32, #tpu.memory_space<vmem>>, vector<1x1x128xf32>
    %18 = vector.shape_cast %17 : vector<1x1x128xf32> to vector<1x128xf32>
    %c6 = arith.constant 6 : index
    %c0_16 = arith.constant 0 : index
    %c0_17 = arith.constant 0 : index
    %19 = vector.load %arg2[%c6, %c0_16, %c0_17] : memref<30x1x128xf32, #tpu.memory_space<vmem>>, vector<1x1x128xf32>
    %20 = vector.shape_cast %19 : vector<1x1x128xf32> to vector<1x128xf32>
    %c7 = arith.constant 7 : index
    %c0_18 = arith.constant 0 : index
    %c0_19 = arith.constant 0 : index
    %21 = vector.load %arg2[%c7, %c0_18, %c0_19] : memref<30x1x128xf32, #tpu.memory_space<vmem>>, vector<1x1x128xf32>
    %22 = vector.shape_cast %21 : vector<1x1x128xf32> to vector<1x128xf32>
    %c8 = arith.constant 8 : index
    %c0_20 = arith.constant 0 : index
    %c0_21 = arith.constant 0 : index
    %23 = vector.load %arg2[%c8, %c0_20, %c0_21] : memref<30x1x128xf32, #tpu.memory_space<vmem>>, vector<1x1x128xf32>
    %24 = vector.shape_cast %23 : vector<1x1x128xf32> to vector<1x128xf32>
    %c9 = arith.constant 9 : index
    %c0_22 = arith.constant 0 : index
    %c0_23 = arith.constant 0 : index
    %25 = vector.load %arg2[%c9, %c0_22, %c0_23] : memref<30x1x128xf32, #tpu.memory_space<vmem>>, vector<1x1x128xf32>
    %26 = vector.shape_cast %25 : vector<1x1x128xf32> to vector<1x128xf32>
    %c1_24 = arith.constant 1 : index
    %c0_25 = arith.constant 0 : index
    %c0_26 = arith.constant 0 : index
    %27 = vector.load %arg3[%c1_24, %c0_25, %c0_26] : memref<30x1x128xf32, #tpu.memory_space<vmem>>, vector<1x1x128xf32>
    %28 = vector.shape_cast %27 : vector<1x1x128xf32> to vector<1x128xf32>
    %c2_27 = arith.constant 2 : index
    %c0_28 = arith.constant 0 : index
    %c0_29 = arith.constant 0 : index
    %29 = vector.load %arg3[%c2_27, %c0_28, %c0_29] : memref<30x1x128xf32, #tpu.memory_space<vmem>>, vector<1x1x128xf32>
    %30 = vector.shape_cast %29 : vector<1x1x128xf32> to vector<1x128xf32>
    %c3_30 = arith.constant 3 : index
    %c0_31 = arith.constant 0 : index
    %c0_32 = arith.constant 0 : index
    %31 = vector.load %arg3[%c3_30, %c0_31, %c0_32] : memref<30x1x128xf32, #tpu.memory_space<vmem>>, vector<1x1x128xf32>
    %32 = vector.shape_cast %31 : vector<1x1x128xf32> to vector<1x128xf32>
    %c4_33 = arith.constant 4 : index
    %c0_34 = arith.constant 0 : index
    %c0_35 = arith.constant 0 : index
    %33 = vector.load %arg3[%c4_33, %c0_34, %c0_35] : memref<30x1x128xf32, #tpu.memory_space<vmem>>, vector<1x1x128xf32>
    %34 = vector.shape_cast %33 : vector<1x1x128xf32> to vector<1x128xf32>
    %c6_36 = arith.constant 6 : index
    %c0_37 = arith.constant 0 : index
    %c0_38 = arith.constant 0 : index
    %35 = vector.load %arg3[%c6_36, %c0_37, %c0_38] : memref<30x1x128xf32, #tpu.memory_space<vmem>>, vector<1x1x128xf32>
    %36 = vector.shape_cast %35 : vector<1x1x128xf32> to vector<1x128xf32>
    %c7_39 = arith.constant 7 : index
    %c0_40 = arith.constant 0 : index
    %c0_41 = arith.constant 0 : index
    %37 = vector.load %arg3[%c7_39, %c0_40, %c0_41] : memref<30x1x128xf32, #tpu.memory_space<vmem>>, vector<1x1x128xf32>
    %38 = vector.shape_cast %37 : vector<1x1x128xf32> to vector<1x128xf32>
    %c8_42 = arith.constant 8 : index
    %c0_43 = arith.constant 0 : index
    %c0_44 = arith.constant 0 : index
    %39 = vector.load %arg3[%c8_42, %c0_43, %c0_44] : memref<30x1x128xf32, #tpu.memory_space<vmem>>, vector<1x1x128xf32>
    %40 = vector.shape_cast %39 : vector<1x1x128xf32> to vector<1x128xf32>
    %c9_45 = arith.constant 9 : index
    %c0_46 = arith.constant 0 : index
    %c0_47 = arith.constant 0 : index
    %41 = vector.load %arg3[%c9_45, %c0_46, %c0_47] : memref<30x1x128xf32, #tpu.memory_space<vmem>>, vector<1x1x128xf32>
    %42 = vector.shape_cast %41 : vector<1x1x128xf32> to vector<1x128xf32>
    %cst_48 = arith.constant 7.000000e+00 : f32
    %43 = vector.broadcast %cst_48 : f32 to vector<1x128xf32>
    %44 = arith.divf %10, %43 : vector<1x128xf32>
    %cst_49 = arith.constant 7.000000e+00 : f32
    %45 = vector.broadcast %cst_49 : f32 to vector<1x128xf32>
    %46 = arith.divf %12, %45 : vector<1x128xf32>
    %cst_50 = arith.constant 7.000000e+00 : f32
    %47 = vector.broadcast %cst_50 : f32 to vector<1x128xf32>
    %48 = arith.divf %28, %47 : vector<1x128xf32>
    %cst_51 = arith.constant 7.000000e+00 : f32
    %49 = vector.broadcast %cst_51 : f32 to vector<1x128xf32>
    %50 = arith.divf %30, %49 : vector<1x128xf32>
    %cst_52 = arith.constant 5.000000e-01 : f32
    %51 = vector.broadcast %cst_52 : f32 to vector<1x128xf32>
    %52 = arith.mulf %51, %14 : vector<1x128xf32>
    %53 = arith.subf %44, %52 : vector<1x128xf32>
    %cst_53 = arith.constant 5.000000e-01 : f32
    %54 = vector.broadcast %cst_53 : f32 to vector<1x128xf32>
    %55 = arith.mulf %54, %16 : vector<1x128xf32>
    %56 = arith.subf %46, %55 : vector<1x128xf32>
    %cst_54 = arith.constant 5.000000e-01 : f32
    %57 = vector.broadcast %cst_54 : f32 to vector<1x128xf32>
    %58 = arith.mulf %57, %14 : vector<1x128xf32>
    %59 = arith.addf %44, %58 : vector<1x128xf32>
    %cst_55 = arith.constant 5.000000e-01 : f32
    %60 = vector.broadcast %cst_55 : f32 to vector<1x128xf32>
    %61 = arith.mulf %60, %16 : vector<1x128xf32>
    %62 = arith.addf %46, %61 : vector<1x128xf32>
    %cst_56 = arith.constant 5.000000e-01 : f32
    %63 = vector.broadcast %cst_56 : f32 to vector<1x128xf32>
    %64 = arith.mulf %63, %32 : vector<1x128xf32>
    %65 = arith.subf %48, %64 : vector<1x128xf32>
    %cst_57 = arith.constant 5.000000e-01 : f32
    %66 = vector.broadcast %cst_57 : f32 to vector<1x128xf32>
    %67 = arith.mulf %66, %34 : vector<1x128xf32>
    %68 = arith.subf %50, %67 : vector<1x128xf32>
    %cst_58 = arith.constant 5.000000e-01 : f32
    %69 = vector.broadcast %cst_58 : f32 to vector<1x128xf32>
    %70 = arith.mulf %69, %32 : vector<1x128xf32>
    %71 = arith.addf %48, %70 : vector<1x128xf32>
    %cst_59 = arith.constant 5.000000e-01 : f32
    %72 = vector.broadcast %cst_59 : f32 to vector<1x128xf32>
    %73 = arith.mulf %72, %34 : vector<1x128xf32>
    %74 = arith.addf %50, %73 : vector<1x128xf32>
    %75 = arith.cmpf olt, %59, %65 : vector<1x128xf32>
    %76 = arith.cmpf ogt, %53, %71 : vector<1x128xf32>
    %77 = arith.ori %75, %76 : vector<1x128xi1>
    %78 = arith.cmpf olt, %62, %68 : vector<1x128xf32>
    %79 = arith.ori %77, %78 : vector<1x128xi1>
    %80 = arith.cmpf ogt, %56, %74 : vector<1x128xf32>
    %81 = arith.ori %79, %80 : vector<1x128xi1>
    %cst_60 = arith.constant dense<true> : vector<1x128xi1>
    %82 = arith.xori %81, %cst_60 : vector<1x128xi1>
    %83 = arith.extui %82 : vector<1x128xi1> to vector<1x128xi32>
    %84 = arith.sitofp %83 : vector<1x128xi32> to vector<1x128xf32>
    %85 = arith.maximumf %53, %65 : vector<1x128xf32>
    %86 = arith.maximumf %56, %68 : vector<1x128xf32>
    %87 = arith.minimumf %59, %71 : vector<1x128xf32>
    %88 = arith.minimumf %62, %74 : vector<1x128xf32>
    %89 = arith.subf %59, %53 : vector<1x128xf32>
    %90 = arith.subf %62, %56 : vector<1x128xf32>
    %91 = arith.mulf %89, %90 : vector<1x128xf32>
    %92 = arith.subf %71, %65 : vector<1x128xf32>
    %93 = arith.subf %74, %68 : vector<1x128xf32>
    %94 = arith.mulf %92, %93 : vector<1x128xf32>
    %95 = arith.subf %87, %85 : vector<1x128xf32>
    %96 = arith.subf %88, %86 : vector<1x128xf32>
    %97 = arith.mulf %95, %96 : vector<1x128xf32>
    %98 = arith.mulf %97, %84 : vector<1x128xf32>
    %99 = arith.addf %91, %94 : vector<1x128xf32>
    %100 = arith.subf %99, %98 : vector<1x128xf32>
    %101 = arith.divf %98, %100 : vector<1x128xf32>
    %cst_61 = arith.constant 7.000000e+00 : f32
    %102 = vector.broadcast %cst_61 : f32 to vector<1x128xf32>
    %103 = arith.divf %20, %102 : vector<1x128xf32>
    %cst_62 = arith.constant 7.000000e+00 : f32
    %104 = vector.broadcast %cst_62 : f32 to vector<1x128xf32>
    %105 = arith.divf %22, %104 : vector<1x128xf32>
    %cst_63 = arith.constant 7.000000e+00 : f32
    %106 = vector.broadcast %cst_63 : f32 to vector<1x128xf32>
    %107 = arith.divf %36, %106 : vector<1x128xf32>
    %cst_64 = arith.constant 7.000000e+00 : f32
    %108 = vector.broadcast %cst_64 : f32 to vector<1x128xf32>
    %109 = arith.divf %38, %108 : vector<1x128xf32>
    %cst_65 = arith.constant 5.000000e-01 : f32
    %110 = vector.broadcast %cst_65 : f32 to vector<1x128xf32>
    %111 = arith.mulf %110, %24 : vector<1x128xf32>
    %112 = arith.subf %103, %111 : vector<1x128xf32>
    %cst_66 = arith.constant 5.000000e-01 : f32
    %113 = vector.broadcast %cst_66 : f32 to vector<1x128xf32>
    %114 = arith.mulf %113, %26 : vector<1x128xf32>
    %115 = arith.subf %105, %114 : vector<1x128xf32>
    %cst_67 = arith.constant 5.000000e-01 : f32
    %116 = vector.broadcast %cst_67 : f32 to vector<1x128xf32>
    %117 = arith.mulf %116, %24 : vector<1x128xf32>
    %118 = arith.addf %103, %117 : vector<1x128xf32>
    %cst_68 = arith.constant 5.000000e-01 : f32
    %119 = vector.broadcast %cst_68 : f32 to vector<1x128xf32>
    %120 = arith.mulf %119, %26 : vector<1x128xf32>
    %121 = arith.addf %105, %120 : vector<1x128xf32>
    %cst_69 = arith.constant 5.000000e-01 : f32
    %122 = vector.broadcast %cst_69 : f32 to vector<1x128xf32>
    %123 = arith.mulf %122, %40 : vector<1x128xf32>
    %124 = arith.subf %107, %123 : vector<1x128xf32>
    %cst_70 = arith.constant 5.000000e-01 : f32
    %125 = vector.broadcast %cst_70 : f32 to vector<1x128xf32>
    %126 = arith.mulf %125, %42 : vector<1x128xf32>
    %127 = arith.subf %109, %126 : vector<1x128xf32>
    %cst_71 = arith.constant 5.000000e-01 : f32
    %128 = vector.broadcast %cst_71 : f32 to vector<1x128xf32>
    %129 = arith.mulf %128, %40 : vector<1x128xf32>
    %130 = arith.addf %107, %129 : vector<1x128xf32>
    %cst_72 = arith.constant 5.000000e-01 : f32
    %131 = vector.broadcast %cst_72 : f32 to vector<1x128xf32>
    %132 = arith.mulf %131, %42 : vector<1x128xf32>
    %133 = arith.addf %109, %132 : vector<1x128xf32>
    %134 = arith.cmpf olt, %118, %124 : vector<1x128xf32>
    %135 = arith.cmpf ogt, %112, %130 : vector<1x128xf32>
    %136 = arith.ori %134, %135 : vector<1x128xi1>
    %137 = arith.cmpf olt, %121, %127 : vector<1x128xf32>
    %138 = arith.ori %136, %137 : vector<1x128xi1>
    %139 = arith.cmpf ogt, %115, %133 : vector<1x128xf32>
    %140 = arith.ori %138, %139 : vector<1x128xi1>
    %cst_73 = arith.constant dense<true> : vector<1x128xi1>
    %141 = arith.xori %140, %cst_73 : vector<1x128xi1>
    %142 = arith.extui %141 : vector<1x128xi1> to vector<1x128xi32>
    %143 = arith.sitofp %142 : vector<1x128xi32> to vector<1x128xf32>
    %144 = arith.maximumf %112, %124 : vector<1x128xf32>
    %145 = arith.maximumf %115, %127 : vector<1x128xf32>
    %146 = arith.minimumf %118, %130 : vector<1x128xf32>
    %147 = arith.minimumf %121, %133 : vector<1x128xf32>
    %148 = arith.subf %118, %112 : vector<1x128xf32>
    %149 = arith.subf %121, %115 : vector<1x128xf32>
    %150 = arith.mulf %148, %149 : vector<1x128xf32>
    %151 = arith.subf %130, %124 : vector<1x128xf32>
    %152 = arith.subf %133, %127 : vector<1x128xf32>
    %153 = arith.mulf %151, %152 : vector<1x128xf32>
    %154 = arith.subf %146, %144 : vector<1x128xf32>
    %155 = arith.subf %147, %145 : vector<1x128xf32>
    %156 = arith.mulf %154, %155 : vector<1x128xf32>
    %157 = arith.mulf %156, %143 : vector<1x128xf32>
    %158 = arith.addf %150, %153 : vector<1x128xf32>
    %159 = arith.subf %158, %157 : vector<1x128xf32>
    %160 = arith.divf %157, %159 : vector<1x128xf32>
    %161 = arith.cmpf oge, %101, %160 : vector<1x128xf32>
    %162 = arith.select %161, %8, %18 : vector<1x128xi1>, vector<1x128xf32>
    %163 = arith.select %161, %101, %160 : vector<1x128xi1>, vector<1x128xf32>
    %164 = arith.select %161, %10, %20 : vector<1x128xi1>, vector<1x128xf32>
    %165 = arith.select %161, %12, %22 : vector<1x128xi1>, vector<1x128xf32>
    %166 = arith.select %161, %14, %24 : vector<1x128xi1>, vector<1x128xf32>
    %167 = arith.select %161, %16, %26 : vector<1x128xi1>, vector<1x128xf32>
    %168 = arith.select %161, %28, %36 : vector<1x128xi1>, vector<1x128xf32>
    %169 = arith.select %161, %30, %38 : vector<1x128xi1>, vector<1x128xf32>
    %170 = arith.select %161, %32, %40 : vector<1x128xi1>, vector<1x128xf32>
    %171 = arith.select %161, %34, %42 : vector<1x128xi1>, vector<1x128xf32>
    %cst_74 = arith.constant 0.000000e+00 : f32
    %172 = vector.broadcast %cst_74 : f32 to vector<1x128xf32>
    %173 = arith.select %6, %166, %172 : vector<1x128xi1>, vector<1x128xf32>
    %174 = math.sqrt %173 : vector<1x128xf32>
    %cst_75 = arith.constant 0.000000e+00 : f32
    %175 = vector.broadcast %cst_75 : f32 to vector<1x128xf32>
    %176 = arith.select %6, %167, %175 : vector<1x128xi1>, vector<1x128xf32>
    %177 = math.sqrt %176 : vector<1x128xf32>
    %cst_76 = arith.constant 0.000000e+00 : f32
    %178 = vector.broadcast %cst_76 : f32 to vector<1x128xf32>
    %179 = arith.select %6, %170, %178 : vector<1x128xi1>, vector<1x128xf32>
    %180 = math.sqrt %179 : vector<1x128xf32>
    %cst_77 = arith.constant 0.000000e+00 : f32
    %181 = vector.broadcast %cst_77 : f32 to vector<1x128xf32>
    %182 = arith.select %6, %171, %181 : vector<1x128xi1>, vector<1x128xf32>
    %183 = math.sqrt %182 : vector<1x128xf32>
    %184 = arith.subf %163, %162 : vector<1x128xf32>
    %185 = arith.mulf %184, %184 : vector<1x128xf32>
    %cst_78 = arith.constant 0.000000e+00 : f32
    %186 = vector.broadcast %cst_78 : f32 to vector<1x128xf32>
    %187 = arith.select %6, %185, %186 : vector<1x128xi1>, vector<1x128xf32>
    %188 = arith.subf %168, %164 : vector<1x128xf32>
    %189 = arith.mulf %188, %188 : vector<1x128xf32>
    %190 = arith.subf %169, %165 : vector<1x128xf32>
    %191 = arith.mulf %190, %190 : vector<1x128xf32>
    %192 = arith.addf %189, %191 : vector<1x128xf32>
    %193 = arith.subf %180, %174 : vector<1x128xf32>
    %194 = arith.mulf %193, %193 : vector<1x128xf32>
    %195 = arith.addf %192, %194 : vector<1x128xf32>
    %196 = arith.subf %183, %177 : vector<1x128xf32>
    %197 = arith.mulf %196, %196 : vector<1x128xf32>
    %198 = arith.addf %195, %197 : vector<1x128xf32>
    %cst_79 = arith.constant 0.000000e+00 : f32
    %199 = vector.broadcast %cst_79 : f32 to vector<1x128xf32>
    %200 = arith.select %6, %198, %199 : vector<1x128xi1>, vector<1x128xf32>
    %cst_80 = arith.constant 0.000000e+00 : f32
    %201 = vector.broadcast %cst_80 : f32 to vector<1x128xf32>
    %c10 = arith.constant 10 : index
    %c0_81 = arith.constant 0 : index
    %c0_82 = arith.constant 0 : index
    %202 = vector.load %arg3[%c10, %c0_81, %c0_82] : memref<30x1x128xf32, #tpu.memory_space<vmem>>, vector<1x1x128xf32>
    %203 = vector.shape_cast %202 : vector<1x1x128xf32> to vector<1x128xf32>
    %c10_83 = arith.constant 10 : index
    %c0_84 = arith.constant 0 : index
    %c0_85 = arith.constant 0 : index
    %204 = vector.load %arg2[%c10_83, %c0_84, %c0_85] : memref<30x1x128xf32, #tpu.memory_space<vmem>>, vector<1x1x128xf32>
    %205 = vector.shape_cast %204 : vector<1x1x128xf32> to vector<1x128xf32>
    %206 = arith.subf %203, %205 : vector<1x128xf32>
    %207 = arith.mulf %206, %206 : vector<1x128xf32>
    %208 = arith.addf %201, %207 : vector<1x128xf32>
    %c11 = arith.constant 11 : index
    %c0_86 = arith.constant 0 : index
    %c0_87 = arith.constant 0 : index
    %209 = vector.load %arg3[%c11, %c0_86, %c0_87] : memref<30x1x128xf32, #tpu.memory_space<vmem>>, vector<1x1x128xf32>
    %210 = vector.shape_cast %209 : vector<1x1x128xf32> to vector<1x128xf32>
    %c11_88 = arith.constant 11 : index
    %c0_89 = arith.constant 0 : index
    %c0_90 = arith.constant 0 : index
    %211 = vector.load %arg2[%c11_88, %c0_89, %c0_90] : memref<30x1x128xf32, #tpu.memory_space<vmem>>, vector<1x1x128xf32>
    %212 = vector.shape_cast %211 : vector<1x1x128xf32> to vector<1x128xf32>
    %213 = arith.subf %210, %212 : vector<1x128xf32>
    %214 = arith.mulf %213, %213 : vector<1x128xf32>
    %215 = arith.addf %208, %214 : vector<1x128xf32>
    %c12 = arith.constant 12 : index
    %c0_91 = arith.constant 0 : index
    %c0_92 = arith.constant 0 : index
    %216 = vector.load %arg3[%c12, %c0_91, %c0_92] : memref<30x1x128xf32, #tpu.memory_space<vmem>>, vector<1x1x128xf32>
    %217 = vector.shape_cast %216 : vector<1x1x128xf32> to vector<1x128xf32>
    %c12_93 = arith.constant 12 : index
    %c0_94 = arith.constant 0 : index
    %c0_95 = arith.constant 0 : index
    %218 = vector.load %arg2[%c12_93, %c0_94, %c0_95] : memref<30x1x128xf32, #tpu.memory_space<vmem>>, vector<1x1x128xf32>
    %219 = vector.shape_cast %218 : vector<1x1x128xf32> to vector<1x128xf32>
    %220 = arith.subf %217, %219 : vector<1x128xf32>
    %221 = arith.mulf %220, %220 : vector<1x128xf32>
    %222 = arith.addf %215, %221 : vector<1x128xf32>
    %c13 = arith.constant 13 : index
    %c0_96 = arith.constant 0 : index
    %c0_97 = arith.constant 0 : index
    %223 = vector.load %arg3[%c13, %c0_96, %c0_97] : memref<30x1x128xf32, #tpu.memory_space<vmem>>, vector<1x1x128xf32>
    %224 = vector.shape_cast %223 : vector<1x1x128xf32> to vector<1x128xf32>
    %c13_98 = arith.constant 13 : index
    %c0_99 = arith.constant 0 : index
    %c0_100 = arith.constant 0 : index
    %225 = vector.load %arg2[%c13_98, %c0_99, %c0_100] : memref<30x1x128xf32, #tpu.memory_space<vmem>>, vector<1x1x128xf32>
    %226 = vector.shape_cast %225 : vector<1x1x128xf32> to vector<1x128xf32>
    %227 = arith.subf %224, %226 : vector<1x128xf32>
    %228 = arith.mulf %227, %227 : vector<1x128xf32>
    %229 = arith.addf %222, %228 : vector<1x128xf32>
    %c14 = arith.constant 14 : index
    %c0_101 = arith.constant 0 : index
    %c0_102 = arith.constant 0 : index
    %230 = vector.load %arg3[%c14, %c0_101, %c0_102] : memref<30x1x128xf32, #tpu.memory_space<vmem>>, vector<1x1x128xf32>
    %231 = vector.shape_cast %230 : vector<1x1x128xf32> to vector<1x128xf32>
    %c14_103 = arith.constant 14 : index
    %c0_104 = arith.constant 0 : index
    %c0_105 = arith.constant 0 : index
    %232 = vector.load %arg2[%c14_103, %c0_104, %c0_105] : memref<30x1x128xf32, #tpu.memory_space<vmem>>, vector<1x1x128xf32>
    %233 = vector.shape_cast %232 : vector<1x1x128xf32> to vector<1x128xf32>
    %234 = arith.subf %231, %233 : vector<1x128xf32>
    %235 = arith.mulf %234, %234 : vector<1x128xf32>
    %236 = arith.addf %229, %235 : vector<1x128xf32>
    %c15 = arith.constant 15 : index
    %c0_106 = arith.constant 0 : index
    %c0_107 = arith.constant 0 : index
    %237 = vector.load %arg3[%c15, %c0_106, %c0_107] : memref<30x1x128xf32, #tpu.memory_space<vmem>>, vector<1x1x128xf32>
    %238 = vector.shape_cast %237 : vector<1x1x128xf32> to vector<1x128xf32>
    %c15_108 = arith.constant 15 : index
    %c0_109 = arith.constant 0 : index
    %c0_110 = arith.constant 0 : index
    %239 = vector.load %arg2[%c15_108, %c0_109, %c0_110] : memref<30x1x128xf32, #tpu.memory_space<vmem>>, vector<1x1x128xf32>
    %240 = vector.shape_cast %239 : vector<1x1x128xf32> to vector<1x128xf32>
    %241 = arith.subf %238, %240 : vector<1x128xf32>
    %242 = arith.mulf %241, %241 : vector<1x128xf32>
    %243 = arith.addf %236, %242 : vector<1x128xf32>
    %c16 = arith.constant 16 : index
    %c0_111 = arith.constant 0 : index
    %c0_112 = arith.constant 0 : index
    %244 = vector.load %arg3[%c16, %c0_111, %c0_112] : memref<30x1x128xf32, #tpu.memory_space<vmem>>, vector<1x1x128xf32>
    %245 = vector.shape_cast %244 : vector<1x1x128xf32> to vector<1x128xf32>
    %c16_113 = arith.constant 16 : index
    %c0_114 = arith.constant 0 : index
    %c0_115 = arith.constant 0 : index
    %246 = vector.load %arg2[%c16_113, %c0_114, %c0_115] : memref<30x1x128xf32, #tpu.memory_space<vmem>>, vector<1x1x128xf32>
    %247 = vector.shape_cast %246 : vector<1x1x128xf32> to vector<1x128xf32>
    %248 = arith.subf %245, %247 : vector<1x128xf32>
    %249 = arith.mulf %248, %248 : vector<1x128xf32>
    %250 = arith.addf %243, %249 : vector<1x128xf32>
    %c17 = arith.constant 17 : index
    %c0_116 = arith.constant 0 : index
    %c0_117 = arith.constant 0 : index
    %251 = vector.load %arg3[%c17, %c0_116, %c0_117] : memref<30x1x128xf32, #tpu.memory_space<vmem>>, vector<1x1x128xf32>
    %252 = vector.shape_cast %251 : vector<1x1x128xf32> to vector<1x128xf32>
    %c17_118 = arith.constant 17 : index
    %c0_119 = arith.constant 0 : index
    %c0_120 = arith.constant 0 : index
    %253 = vector.load %arg2[%c17_118, %c0_119, %c0_120] : memref<30x1x128xf32, #tpu.memory_space<vmem>>, vector<1x1x128xf32>
    %254 = vector.shape_cast %253 : vector<1x1x128xf32> to vector<1x128xf32>
    %255 = arith.subf %252, %254 : vector<1x128xf32>
    %256 = arith.mulf %255, %255 : vector<1x128xf32>
    %257 = arith.addf %250, %256 : vector<1x128xf32>
    %c18 = arith.constant 18 : index
    %c0_121 = arith.constant 0 : index
    %c0_122 = arith.constant 0 : index
    %258 = vector.load %arg3[%c18, %c0_121, %c0_122] : memref<30x1x128xf32, #tpu.memory_space<vmem>>, vector<1x1x128xf32>
    %259 = vector.shape_cast %258 : vector<1x1x128xf32> to vector<1x128xf32>
    %c18_123 = arith.constant 18 : index
    %c0_124 = arith.constant 0 : index
    %c0_125 = arith.constant 0 : index
    %260 = vector.load %arg2[%c18_123, %c0_124, %c0_125] : memref<30x1x128xf32, #tpu.memory_space<vmem>>, vector<1x1x128xf32>
    %261 = vector.shape_cast %260 : vector<1x1x128xf32> to vector<1x128xf32>
    %262 = arith.subf %259, %261 : vector<1x128xf32>
    %263 = arith.mulf %262, %262 : vector<1x128xf32>
    %264 = arith.addf %257, %263 : vector<1x128xf32>
    %c19 = arith.constant 19 : index
    %c0_126 = arith.constant 0 : index
    %c0_127 = arith.constant 0 : index
    %265 = vector.load %arg3[%c19, %c0_126, %c0_127] : memref<30x1x128xf32, #tpu.memory_space<vmem>>, vector<1x1x128xf32>
    %266 = vector.shape_cast %265 : vector<1x1x128xf32> to vector<1x128xf32>
    %c19_128 = arith.constant 19 : index
    %c0_129 = arith.constant 0 : index
    %c0_130 = arith.constant 0 : index
    %267 = vector.load %arg2[%c19_128, %c0_129, %c0_130] : memref<30x1x128xf32, #tpu.memory_space<vmem>>, vector<1x1x128xf32>
    %268 = vector.shape_cast %267 : vector<1x1x128xf32> to vector<1x128xf32>
    %269 = arith.subf %266, %268 : vector<1x128xf32>
    %270 = arith.mulf %269, %269 : vector<1x128xf32>
    %271 = arith.addf %264, %270 : vector<1x128xf32>
    %c20 = arith.constant 20 : index
    %c0_131 = arith.constant 0 : index
    %c0_132 = arith.constant 0 : index
    %272 = vector.load %arg3[%c20, %c0_131, %c0_132] : memref<30x1x128xf32, #tpu.memory_space<vmem>>, vector<1x1x128xf32>
    %273 = vector.shape_cast %272 : vector<1x1x128xf32> to vector<1x128xf32>
    %c20_133 = arith.constant 20 : index
    %c0_134 = arith.constant 0 : index
    %c0_135 = arith.constant 0 : index
    %274 = vector.load %arg2[%c20_133, %c0_134, %c0_135] : memref<30x1x128xf32, #tpu.memory_space<vmem>>, vector<1x1x128xf32>
    %275 = vector.shape_cast %274 : vector<1x1x128xf32> to vector<1x128xf32>
    %276 = arith.subf %273, %275 : vector<1x128xf32>
    %277 = arith.mulf %276, %276 : vector<1x128xf32>
    %278 = arith.addf %271, %277 : vector<1x128xf32>
    %c21 = arith.constant 21 : index
    %c0_136 = arith.constant 0 : index
    %c0_137 = arith.constant 0 : index
    %279 = vector.load %arg3[%c21, %c0_136, %c0_137] : memref<30x1x128xf32, #tpu.memory_space<vmem>>, vector<1x1x128xf32>
    %280 = vector.shape_cast %279 : vector<1x1x128xf32> to vector<1x128xf32>
    %c21_138 = arith.constant 21 : index
    %c0_139 = arith.constant 0 : index
    %c0_140 = arith.constant 0 : index
    %281 = vector.load %arg2[%c21_138, %c0_139, %c0_140] : memref<30x1x128xf32, #tpu.memory_space<vmem>>, vector<1x1x128xf32>
    %282 = vector.shape_cast %281 : vector<1x1x128xf32> to vector<1x128xf32>
    %283 = arith.subf %280, %282 : vector<1x128xf32>
    %284 = arith.mulf %283, %283 : vector<1x128xf32>
    %285 = arith.addf %278, %284 : vector<1x128xf32>
    %c22 = arith.constant 22 : index
    %c0_141 = arith.constant 0 : index
    %c0_142 = arith.constant 0 : index
    %286 = vector.load %arg3[%c22, %c0_141, %c0_142] : memref<30x1x128xf32, #tpu.memory_space<vmem>>, vector<1x1x128xf32>
    %287 = vector.shape_cast %286 : vector<1x1x128xf32> to vector<1x128xf32>
    %c22_143 = arith.constant 22 : index
    %c0_144 = arith.constant 0 : index
    %c0_145 = arith.constant 0 : index
    %288 = vector.load %arg2[%c22_143, %c0_144, %c0_145] : memref<30x1x128xf32, #tpu.memory_space<vmem>>, vector<1x1x128xf32>
    %289 = vector.shape_cast %288 : vector<1x1x128xf32> to vector<1x128xf32>
    %290 = arith.subf %287, %289 : vector<1x128xf32>
    %291 = arith.mulf %290, %290 : vector<1x128xf32>
    %292 = arith.addf %285, %291 : vector<1x128xf32>
    %c23 = arith.constant 23 : index
    %c0_146 = arith.constant 0 : index
    %c0_147 = arith.constant 0 : index
    %293 = vector.load %arg3[%c23, %c0_146, %c0_147] : memref<30x1x128xf32, #tpu.memory_space<vmem>>, vector<1x1x128xf32>
    %294 = vector.shape_cast %293 : vector<1x1x128xf32> to vector<1x128xf32>
    %c23_148 = arith.constant 23 : index
    %c0_149 = arith.constant 0 : index
    %c0_150 = arith.constant 0 : index
    %295 = vector.load %arg2[%c23_148, %c0_149, %c0_150] : memref<30x1x128xf32, #tpu.memory_space<vmem>>, vector<1x1x128xf32>
    %296 = vector.shape_cast %295 : vector<1x1x128xf32> to vector<1x128xf32>
    %297 = arith.subf %294, %296 : vector<1x128xf32>
    %298 = arith.mulf %297, %297 : vector<1x128xf32>
    %299 = arith.addf %292, %298 : vector<1x128xf32>
    %c24 = arith.constant 24 : index
    %c0_151 = arith.constant 0 : index
    %c0_152 = arith.constant 0 : index
    %300 = vector.load %arg3[%c24, %c0_151, %c0_152] : memref<30x1x128xf32, #tpu.memory_space<vmem>>, vector<1x1x128xf32>
    %301 = vector.shape_cast %300 : vector<1x1x128xf32> to vector<1x128xf32>
    %c24_153 = arith.constant 24 : index
    %c0_154 = arith.constant 0 : index
    %c0_155 = arith.constant 0 : index
    %302 = vector.load %arg2[%c24_153, %c0_154, %c0_155] : memref<30x1x128xf32, #tpu.memory_space<vmem>>, vector<1x1x128xf32>
    %303 = vector.shape_cast %302 : vector<1x1x128xf32> to vector<1x128xf32>
    %304 = arith.subf %301, %303 : vector<1x128xf32>
    %305 = arith.mulf %304, %304 : vector<1x128xf32>
    %306 = arith.addf %299, %305 : vector<1x128xf32>
    %c25 = arith.constant 25 : index
    %c0_156 = arith.constant 0 : index
    %c0_157 = arith.constant 0 : index
    %307 = vector.load %arg3[%c25, %c0_156, %c0_157] : memref<30x1x128xf32, #tpu.memory_space<vmem>>, vector<1x1x128xf32>
    %308 = vector.shape_cast %307 : vector<1x1x128xf32> to vector<1x128xf32>
    %c25_158 = arith.constant 25 : index
    %c0_159 = arith.constant 0 : index
    %c0_160 = arith.constant 0 : index
    %309 = vector.load %arg2[%c25_158, %c0_159, %c0_160] : memref<30x1x128xf32, #tpu.memory_space<vmem>>, vector<1x1x128xf32>
    %310 = vector.shape_cast %309 : vector<1x1x128xf32> to vector<1x128xf32>
    %311 = arith.subf %308, %310 : vector<1x128xf32>
    %312 = arith.mulf %311, %311 : vector<1x128xf32>
    %313 = arith.addf %306, %312 : vector<1x128xf32>
    %c26 = arith.constant 26 : index
    %c0_161 = arith.constant 0 : index
    %c0_162 = arith.constant 0 : index
    %314 = vector.load %arg3[%c26, %c0_161, %c0_162] : memref<30x1x128xf32, #tpu.memory_space<vmem>>, vector<1x1x128xf32>
    %315 = vector.shape_cast %314 : vector<1x1x128xf32> to vector<1x128xf32>
    %c26_163 = arith.constant 26 : index
    %c0_164 = arith.constant 0 : index
    %c0_165 = arith.constant 0 : index
    %316 = vector.load %arg2[%c26_163, %c0_164, %c0_165] : memref<30x1x128xf32, #tpu.memory_space<vmem>>, vector<1x1x128xf32>
    %317 = vector.shape_cast %316 : vector<1x1x128xf32> to vector<1x128xf32>
    %318 = arith.subf %315, %317 : vector<1x128xf32>
    %319 = arith.mulf %318, %318 : vector<1x128xf32>
    %320 = arith.addf %313, %319 : vector<1x128xf32>
    %c27 = arith.constant 27 : index
    %c0_166 = arith.constant 0 : index
    %c0_167 = arith.constant 0 : index
    %321 = vector.load %arg3[%c27, %c0_166, %c0_167] : memref<30x1x128xf32, #tpu.memory_space<vmem>>, vector<1x1x128xf32>
    %322 = vector.shape_cast %321 : vector<1x1x128xf32> to vector<1x128xf32>
    %c27_168 = arith.constant 27 : index
    %c0_169 = arith.constant 0 : index
    %c0_170 = arith.constant 0 : index
    %323 = vector.load %arg2[%c27_168, %c0_169, %c0_170] : memref<30x1x128xf32, #tpu.memory_space<vmem>>, vector<1x1x128xf32>
    %324 = vector.shape_cast %323 : vector<1x1x128xf32> to vector<1x128xf32>
    %325 = arith.subf %322, %324 : vector<1x128xf32>
    %326 = arith.mulf %325, %325 : vector<1x128xf32>
    %327 = arith.addf %320, %326 : vector<1x128xf32>
    %c28 = arith.constant 28 : index
    %c0_171 = arith.constant 0 : index
    %c0_172 = arith.constant 0 : index
    %328 = vector.load %arg3[%c28, %c0_171, %c0_172] : memref<30x1x128xf32, #tpu.memory_space<vmem>>, vector<1x1x128xf32>
    %329 = vector.shape_cast %328 : vector<1x1x128xf32> to vector<1x128xf32>
    %c28_173 = arith.constant 28 : index
    %c0_174 = arith.constant 0 : index
    %c0_175 = arith.constant 0 : index
    %330 = vector.load %arg2[%c28_173, %c0_174, %c0_175] : memref<30x1x128xf32, #tpu.memory_space<vmem>>, vector<1x1x128xf32>
    %331 = vector.shape_cast %330 : vector<1x1x128xf32> to vector<1x128xf32>
    %332 = arith.subf %329, %331 : vector<1x128xf32>
    %333 = arith.mulf %332, %332 : vector<1x128xf32>
    %334 = arith.addf %327, %333 : vector<1x128xf32>
    %c29 = arith.constant 29 : index
    %c0_176 = arith.constant 0 : index
    %c0_177 = arith.constant 0 : index
    %335 = vector.load %arg3[%c29, %c0_176, %c0_177] : memref<30x1x128xf32, #tpu.memory_space<vmem>>, vector<1x1x128xf32>
    %336 = vector.shape_cast %335 : vector<1x1x128xf32> to vector<1x128xf32>
    %c29_178 = arith.constant 29 : index
    %c0_179 = arith.constant 0 : index
    %c0_180 = arith.constant 0 : index
    %337 = vector.load %arg2[%c29_178, %c0_179, %c0_180] : memref<30x1x128xf32, #tpu.memory_space<vmem>>, vector<1x1x128xf32>
    %338 = vector.shape_cast %337 : vector<1x1x128xf32> to vector<1x128xf32>
    %339 = arith.subf %336, %338 : vector<1x128xf32>
    %340 = arith.mulf %339, %339 : vector<1x128xf32>
    %341 = arith.addf %334, %340 : vector<1x128xf32>
    %cst_181 = arith.constant 0.000000e+00 : f32
    %342 = vector.broadcast %cst_181 : f32 to vector<1x128xf32>
    %343 = arith.select %6, %341, %342 : vector<1x128xi1>, vector<1x128xf32>
    %344 = arith.select %161, %18, %8 : vector<1x128xi1>, vector<1x128xf32>
    %345 = arith.select %161, %160, %101 : vector<1x128xi1>, vector<1x128xf32>
    %346 = arith.subf %345, %344 : vector<1x128xf32>
    %347 = arith.mulf %346, %346 : vector<1x128xf32>
    %cst_182 = arith.constant 0.000000e+00 : f32
    %348 = vector.broadcast %cst_182 : f32 to vector<1x128xf32>
    %349 = arith.select %6, %347, %348 : vector<1x128xi1>, vector<1x128xf32>
    %350 = arith.mulf %8, %8 : vector<1x128xf32>
    %351 = arith.mulf %18, %18 : vector<1x128xf32>
    %352 = arith.addf %350, %351 : vector<1x128xf32>
    %cst_183 = arith.constant 0.000000e+00 : f32
    %353 = vector.broadcast %cst_183 : f32 to vector<1x128xf32>
    %354 = arith.select %6, %353, %352 : vector<1x128xi1>, vector<1x128xf32>
    %355 = arith.addf %349, %354 : vector<1x128xf32>
    %c0_184 = arith.constant 0 : index
    %c0_185 = arith.constant 0 : index
    %c0_186 = arith.constant 0 : index
    %356 = vector.load %arg5[%c0_184, %c0_185, %c0_186] : memref<4x1x128xf32, #tpu.memory_space<vmem>>, vector<1x1x128xf32>
    %357 = vector.shape_cast %356 : vector<1x1x128xf32> to vector<1x128xf32>
    %358 = arith.addf %357, %187 : vector<1x128xf32>
    %c0_187 = arith.constant 0 : index
    %c0_188 = arith.constant 0 : index
    %c0_189 = arith.constant 0 : index
    %359 = vector.load %arg5[%c0_187, %c0_188, %c0_189] : memref<4x1x128xf32, #tpu.memory_space<vmem>>, vector<1x1x128xf32>
    %360 = vector.shape_cast %359 : vector<1x1x128xf32> to vector<1x128xf32>
    %361 = vector.shape_cast %358 : vector<1x128xf32> to vector<1x1x128xf32>
    tpu.vector_store %arg5[%c0_187, %c0_188, %c0_189], %361 {strides = array<i32>} : memref<4x1x128xf32, #tpu.memory_space<vmem>>, vector<1x1x128xf32>,
    %c1_190 = arith.constant 1 : index
    %c0_191 = arith.constant 0 : index
    %c0_192 = arith.constant 0 : index
    %362 = vector.load %arg5[%c1_190, %c0_191, %c0_192] : memref<4x1x128xf32, #tpu.memory_space<vmem>>, vector<1x1x128xf32>
    %363 = vector.shape_cast %362 : vector<1x1x128xf32> to vector<1x128xf32>
    %364 = arith.addf %363, %200 : vector<1x128xf32>
    %c1_193 = arith.constant 1 : index
    %c0_194 = arith.constant 0 : index
    %c0_195 = arith.constant 0 : index
    %365 = vector.load %arg5[%c1_193, %c0_194, %c0_195] : memref<4x1x128xf32, #tpu.memory_space<vmem>>, vector<1x1x128xf32>
    %366 = vector.shape_cast %365 : vector<1x1x128xf32> to vector<1x128xf32>
    %367 = vector.shape_cast %364 : vector<1x128xf32> to vector<1x1x128xf32>
    tpu.vector_store %arg5[%c1_193, %c0_194, %c0_195], %367 {strides = array<i32>} : memref<4x1x128xf32, #tpu.memory_space<vmem>>, vector<1x1x128xf32>,
    %c2_196 = arith.constant 2 : index
    %c0_197 = arith.constant 0 : index
    %c0_198 = arith.constant 0 : index
    %368 = vector.load %arg5[%c2_196, %c0_197, %c0_198] : memref<4x1x128xf32, #tpu.memory_space<vmem>>, vector<1x1x128xf32>
    %369 = vector.shape_cast %368 : vector<1x1x128xf32> to vector<1x128xf32>
    %370 = arith.addf %369, %343 : vector<1x128xf32>
    %c2_199 = arith.constant 2 : index
    %c0_200 = arith.constant 0 : index
    %c0_201 = arith.constant 0 : index
    %371 = vector.load %arg5[%c2_199, %c0_200, %c0_201] : memref<4x1x128xf32, #tpu.memory_space<vmem>>, vector<1x1x128xf32>
    %372 = vector.shape_cast %371 : vector<1x1x128xf32> to vector<1x128xf32>
    %373 = vector.shape_cast %370 : vector<1x128xf32> to vector<1x1x128xf32>
    tpu.vector_store %arg5[%c2_199, %c0_200, %c0_201], %373 {strides = array<i32>} : memref<4x1x128xf32, #tpu.memory_space<vmem>>, vector<1x1x128xf32>,
    %c3_202 = arith.constant 3 : index
    %c0_203 = arith.constant 0 : index
    %c0_204 = arith.constant 0 : index
    %374 = vector.load %arg5[%c3_202, %c0_203, %c0_204] : memref<4x1x128xf32, #tpu.memory_space<vmem>>, vector<1x1x128xf32>
    %375 = vector.shape_cast %374 : vector<1x1x128xf32> to vector<1x128xf32>
    %376 = arith.addf %375, %355 : vector<1x128xf32>
    %c3_205 = arith.constant 3 : index
    %c0_206 = arith.constant 0 : index
    %c0_207 = arith.constant 0 : index
    %377 = vector.load %arg5[%c3_205, %c0_206, %c0_207] : memref<4x1x128xf32, #tpu.memory_space<vmem>>, vector<1x1x128xf32>
    %378 = vector.shape_cast %377 : vector<1x1x128xf32> to vector<1x128xf32>
    %379 = vector.shape_cast %376 : vector<1x128xf32> to vector<1x1x128xf32>
    tpu.vector_store %arg5[%c3_205, %c0_206, %c0_207], %379 {strides = array<i32>} : memref<4x1x128xf32, #tpu.memory_space<vmem>>, vector<1x1x128xf32>,
    %c0_i32_208 = arith.constant 0 : i32
    %380 = arith.cmpi eq, %arg1, %c0_i32_208 : i32
    %381 = arith.extui %380 : i1 to i32
    %cst_209 = arith.constant 0.000000e+00 : f32
    %c0_i32_210 = arith.constant 0 : i32
    %382 = arith.cmpi ne, %381, %c0_i32_210 : i32
    scf.if %382 {
      %c0_211 = arith.constant 0 : index
      %c0_212 = arith.constant 0 : index
      %c0_213 = arith.constant 0 : index
      %383 = vector.load %arg5[%c0_211, %c0_212, %c0_213] : memref<4x1x128xf32, #tpu.memory_space<vmem>>, vector<1x1x128xf32>
      %384 = vector.shape_cast %383 : vector<1x1x128xf32> to vector<1x128xf32>
      %cst_214 = arith.constant dense<0.000000e+00> : vector<1xf32>
      %385 = vector.multi_reduction <add>, %384, %cst_214 [1] : vector<1x128xf32> to vector<1xf32>
      %386 = vector.shape_cast %385 : vector<1xf32> to vector<1x1xf32>
      %cst_215 = arith.constant dense<0.000000e+00> : vector<1xf32>
      %387 = vector.multi_reduction <add>, %386, %cst_215 [0] : vector<1x1xf32> to vector<1xf32>
      %388 = vector.shape_cast %387 : vector<1xf32> to vector<1x1xf32>
      %c1_216 = arith.constant 1 : index
      %c0_217 = arith.constant 0 : index
      %c0_218 = arith.constant 0 : index
      %389 = vector.load %arg5[%c1_216, %c0_217, %c0_218] : memref<4x1x128xf32, #tpu.memory_space<vmem>>, vector<1x1x128xf32>
      %390 = vector.shape_cast %389 : vector<1x1x128xf32> to vector<1x128xf32>
      %cst_219 = arith.constant dense<0.000000e+00> : vector<1xf32>
      %391 = vector.multi_reduction <add>, %390, %cst_219 [1] : vector<1x128xf32> to vector<1xf32>
      %392 = vector.shape_cast %391 : vector<1xf32> to vector<1x1xf32>
      %cst_220 = arith.constant dense<0.000000e+00> : vector<1xf32>
      %393 = vector.multi_reduction <add>, %392, %cst_220 [0] : vector<1x1xf32> to vector<1xf32>
      %394 = vector.shape_cast %393 : vector<1xf32> to vector<1x1xf32>
      %cst_221 = arith.constant 5.000000e+00 : f32
      %395 = vector.broadcast %cst_221 : f32 to vector<1x1xf32>
      %396 = arith.mulf %395, %394 : vector<1x1xf32>
      %c2_222 = arith.constant 2 : index
      %c0_223 = arith.constant 0 : index
      %c0_224 = arith.constant 0 : index
      %397 = vector.load %arg5[%c2_222, %c0_223, %c0_224] : memref<4x1x128xf32, #tpu.memory_space<vmem>>, vector<1x1x128xf32>
      %398 = vector.shape_cast %397 : vector<1x1x128xf32> to vector<1x128xf32>
      %cst_225 = arith.constant dense<0.000000e+00> : vector<1xf32>
      %399 = vector.multi_reduction <add>, %398, %cst_225 [1] : vector<1x128xf32> to vector<1xf32>
      %400 = vector.shape_cast %399 : vector<1xf32> to vector<1x1xf32>
      %cst_226 = arith.constant dense<0.000000e+00> : vector<1xf32>
      %401 = vector.multi_reduction <add>, %400, %cst_226 [0] : vector<1x1xf32> to vector<1xf32>
      %402 = vector.shape_cast %401 : vector<1xf32> to vector<1x1xf32>
      %c3_227 = arith.constant 3 : index
      %c0_228 = arith.constant 0 : index
      %c0_229 = arith.constant 0 : index
      %403 = vector.load %arg5[%c3_227, %c0_228, %c0_229] : memref<4x1x128xf32, #tpu.memory_space<vmem>>, vector<1x1x128xf32>
      %404 = vector.shape_cast %403 : vector<1x1x128xf32> to vector<1x128xf32>
      %cst_230 = arith.constant dense<0.000000e+00> : vector<1xf32>
      %405 = vector.multi_reduction <add>, %404, %cst_230 [1] : vector<1x128xf32> to vector<1xf32>
      %406 = vector.shape_cast %405 : vector<1xf32> to vector<1x1xf32>
      %cst_231 = arith.constant dense<0.000000e+00> : vector<1xf32>
      %407 = vector.multi_reduction <add>, %406, %cst_231 [0] : vector<1x1xf32> to vector<1xf32>
      %408 = vector.shape_cast %407 : vector<1xf32> to vector<1x1xf32>
      %cst_232 = arith.constant 5.000000e-01 : f32
      %409 = vector.broadcast %cst_232 : f32 to vector<1x1xf32>
      %410 = arith.mulf %409, %408 : vector<1x1xf32>
      %411 = arith.addf %388, %396 : vector<1x1xf32>
      %412 = arith.addf %411, %402 : vector<1x1xf32>
      %413 = arith.addf %412, %410 : vector<1x1xf32>
      %414 = tpu.iota {dimensions = array<i32: 1>} : vector<1x128xi32>
      %c0_i32_233 = arith.constant 0 : i32
      %415 = vector.broadcast %c0_i32_233 : i32 to vector<1x128xi32>
      %416 = arith.cmpi eq, %414, %415 : vector<1x128xi32>
      %417 = vector.shape_cast %413 : vector<1x1xf32> to vector<1x1xf32>
      %418 = vector.broadcast %417 : vector<1x1xf32> to vector<1x128xf32>
      %419 = vector.broadcast %cst_209 : f32 to vector<1x128xf32>
      %420 = arith.select %416, %418, %419 : vector<1x128xi1>, vector<1x128xf32>
      %c1_i32 = arith.constant 1 : i32
      %421 = vector.broadcast %c1_i32 : i32 to vector<1x128xi32>
      %422 = arith.cmpi eq, %414, %421 : vector<1x128xi32>
      %423 = vector.shape_cast %402 : vector<1x1xf32> to vector<1x1xf32>
      %424 = vector.broadcast %423 : vector<1x1xf32> to vector<1x128xf32>
      %425 = vector.broadcast %cst_209 : f32 to vector<1x128xf32>
      %426 = arith.select %422, %424, %425 : vector<1x128xi1>, vector<1x128xf32>
      %427 = arith.addf %420, %426 : vector<1x128xf32>
      %c2_i32 = arith.constant 2 : i32
      %428 = vector.broadcast %c2_i32 : i32 to vector<1x128xi32>
      %429 = arith.cmpi eq, %414, %428 : vector<1x128xi32>
      %430 = vector.shape_cast %388 : vector<1x1xf32> to vector<1x1xf32>
      %431 = vector.broadcast %430 : vector<1x1xf32> to vector<1x128xf32>
      %432 = vector.broadcast %cst_209 : f32 to vector<1x128xf32>
      %433 = arith.select %429, %431, %432 : vector<1x128xi1>, vector<1x128xf32>
      %434 = arith.addf %427, %433 : vector<1x128xf32>
      %c3_i32 = arith.constant 3 : i32
      %435 = vector.broadcast %c3_i32 : i32 to vector<1x128xi32>
      %436 = arith.cmpi eq, %414, %435 : vector<1x128xi32>
      %437 = vector.shape_cast %396 : vector<1x1xf32> to vector<1x1xf32>
      %438 = vector.broadcast %437 : vector<1x1xf32> to vector<1x128xf32>
      %439 = vector.broadcast %cst_209 : f32 to vector<1x128xf32>
      %440 = arith.select %436, %438, %439 : vector<1x128xi1>, vector<1x128xf32>
      %441 = arith.addf %434, %440 : vector<1x128xf32>
      %c4_i32 = arith.constant 4 : i32
      %442 = vector.broadcast %c4_i32 : i32 to vector<1x128xi32>
      %443 = arith.cmpi eq, %414, %442 : vector<1x128xi32>
      %444 = vector.shape_cast %410 : vector<1x1xf32> to vector<1x1xf32>
      %445 = vector.broadcast %444 : vector<1x1xf32> to vector<1x128xf32>
      %446 = vector.broadcast %cst_209 : f32 to vector<1x128xf32>
      %447 = arith.select %443, %445, %446 : vector<1x128xi1>, vector<1x128xf32>
      %448 = arith.addf %441, %447 : vector<1x128xf32>
      %cst_234 = arith.constant 5.000000e-01 : f32
      %449 = vector.broadcast %cst_234 : f32 to vector<1x128xf32>
      %450 = arith.mulf %448, %449 : vector<1x128xf32>
      %c0_235 = arith.constant 0 : index
      %c0_236 = arith.constant 0 : index
      %c0_237 = arith.constant 0 : index
      %451 = vector.load %arg4[%c0_235, %c0_236, %c0_237] : memref<1x1x128xf32, #tpu.memory_space<vmem>>, vector<1x1x128xf32>
      %452 = vector.shape_cast %451 : vector<1x1x128xf32> to vector<1x128xf32>
      %453 = vector.shape_cast %450 : vector<1x128xf32> to vector<1x1x128xf32>
      tpu.vector_store %arg4[%c0_235, %c0_236, %c0_237], %453 {strides = array<i32>} : memref<1x1x128xf32, #tpu.memory_space<vmem>>, vector<1x1x128xf32>,
    } else {
    }
    return
  }
  func.func @transform_0(%arg0: i32, %arg1: i32) -> (i32, i32, i32) {
    %c1_i32 = arith.constant 1 : i32
    %0 = arith.muli %arg0, %c1_i32 : i32
    %1 = arith.addi %0, %arg1 : i32
    %c0_i32 = arith.constant 0 : i32
    %c0_i32_0 = arith.constant 0 : i32
    %c0_i32_1 = arith.constant 0 : i32
    return %c0_i32, %1, %c0_i32_0 : i32, i32, i32
  }
  func.func @transform_1(%arg0: i32, %arg1: i32) -> (i32, i32, i32) {
    %c1_i32 = arith.constant 1 : i32
    %0 = arith.muli %arg0, %c1_i32 : i32
    %1 = arith.addi %0, %arg1 : i32
    %c0_i32 = arith.constant 0 : i32
    %c0_i32_0 = arith.constant 0 : i32
    %c0_i32_1 = arith.constant 0 : i32
    return %c0_i32, %1, %c0_i32_0 : i32, i32, i32
  }
  func.func @transform_2(%arg0: i32, %arg1: i32) -> (i32, i32, i32) {
    %c0_i32 = arith.constant 0 : i32
    %c0_i32_0 = arith.constant 0 : i32
    %c0_i32_1 = arith.constant 0 : i32
    return %arg0, %c0_i32, %c0_i32_0 : i32, i32, i32
  }
}

</mosaic_0001>

<bundles_post_ra>
// kernel: tpu_custom_call.1
= control target key start
LH: loop header
LB: loop body
LE: loop exit
PB: predicated region body
PF: predicated region fallthrough
CT: control target
= control target key end

     0   :  { %7 = vsyncpa [#allocation4], 0  ;;  %s816_s0 = inlined_call_operand.hbm [shape: f32[30,1,128], index: 0, kind: input, shape index: {}]   ;;  %s817_s1 = inlined_call_operand.hbm [shape: f32[30,1,128], index: 1, kind: input, shape index: {}]   ;;  %s818_s2 = inlined_call_operand.hbm [shape: f32[1,1,128], index: 2, kind: output, shape index: {}]  }
   0x1   :  { %8 = vsyncpa [#allocation7], 0 }
   0x2   :  { %9 = vsyncpa [#allocation5], 0  ;;  %s562_s9 = smov [#allocation3]   ;;  %s490_s13 = scalar_lea.hbm %s816_s0, 480 }
   0x3   :  { %s18_s10 = sshll.u32 %s562_s9, 4  ;;  %p491_p0 = scmp.ne.s32.totalorder %s816_s0, %s490_s13  ;;  %s19_s10 = int_to_ptr.vmem [resolvable:$true] %s18_s10 }
   0x4   :  { %p494_p1 = scmp.lt.u32.totalorder %s490_s13, %s816_s0 }
   0x6   :  { %p496_p2 = pnand %p494_p1, %p491_p0 }
   0x8   :  { %499 = shalt.err (!%p496_p2)
}
   0x9   :  { %s500_s18 = scalar_lea.vmem %s19_s10, 480  ;;  %p505_p4 = scmp.lt.s32.totalorder %s19_s10, %s19_s10 }
   0xa   :  { %p501_p3 = scmp.ne.s32.totalorder %s19_s10, %s500_s18  ;;  %p506_p5 = scmp.lt.s32.totalorder %s500_s18, %s500_s18 }
   0xc   :  { %p507_p6 = por %p506_p5, %p505_p4 }
   0xe   :  { %p508_p7 = pnand %p507_p6, %p501_p3 }
  0x10   :  { %511 = shalt.err (!%p508_p7)
}
  0x11   :  { %s563_s19 = smov 16   ;;  %s564_s20 = smov 1  }
  0x12   :  { %24 = dma.hbm_to_vmem [thread:$0]  %s816_s0, 480, %s19_s10, [#allocation4], %s563_s19, %s563_s19, %s564_s20  }
  0x13   :  { %s565_s23 = smov [#allocation6]   ;;  %s512_s27 = scalar_lea.hbm %s817_s1, 480 }
  0x14   :  { %s33_s24 = sshll.u32 %s565_s23, 4  ;;  %p513_p8 = scmp.ne.s32.totalorder %s817_s1, %s512_s27  ;;  %s34_s24 = int_to_ptr.vmem [resolvable:$true] %s33_s24 }
  0x15   :  { %p516_p9 = scmp.lt.u32.totalorder %s512_s27, %s817_s1 }
  0x17   :  { %p518_p10 = pnand %p516_p9, %p513_p8 }
  0x19   :  { %521 = shalt.err (!%p518_p10)
}
  0x1a   :  { %s522_s4 = scalar_lea.vmem %s34_s24, 480  ;;  %p527_p12 = scmp.lt.s32.totalorder %s34_s24, %s34_s24 }
  0x1b   :  { %p523_p11 = scmp.ne.s32.totalorder %s34_s24, %s522_s4  ;;  %p528_p13 = scmp.lt.s32.totalorder %s522_s4, %s522_s4 }
  0x1d   :  { %p529_p0 = por %p528_p13, %p527_p12 }
  0x1f   :  { %p530_p1 = pnand %p529_p0, %p523_p11 }
  0x21   :  { %533 = shalt.err (!%p530_p1)
}
  0x22   :  { %39 = dma.hbm_to_vmem [thread:$0]  %s817_s1, 480, %s34_s24, [#allocation7], %s563_s19, %s563_s19, %s564_s20  }
  0x23   :  { %556 = dma.done.wait [#allocation4], 480  }
  0x24   :  { %557 = vsyncadd [#allocation4], 4294966816 }
  0x25   :  { %558 = dma.done.wait [#allocation7], 480  }
  0x26   :  { %559 = vsyncadd [#allocation7], 4294966816  ;;  %v566_v0 = vmov 0.0   ;;  %v612_v1 = vld [vmem:[#allocation3 + $0x1] sm:$0x1]  ;;  %vm567_vm7 = vmmov 1  }
  0x27   :  { %53 = vst [vmem:[#allocation2 + $0x1] sm:$0x1] %v566_v0  ;;  %52 = vst [vmem:[#allocation2] sm:$0x1] %v566_v0  ;;  %v614_v2 = vld [vmem:[#allocation3 + $0x2] sm:$0x1] }
  0x28   :  { %54 = vst [vmem:[#allocation2 + $0x2] sm:$0x1] %v566_v0  ;;  %55 = vst [vmem:[#allocation2 + $0x3] sm:$0x1] %v566_v0  ;;  %v616_v3 = vld [vmem:[#allocation3 + $0x3] sm:$0x1] }
  0x29   :  { %v618_v4 = vld [vmem:[#allocation3 + $0x4] sm:$0x1]  ;;  %v620_v5 = vld [vmem:[#allocation6 + $0x1] sm:$0x1]  ;;  %v622_v6 = vld [vmem:[#allocation3 + $0x6] sm:$0x1] }
  0x2a   :  { %v624_v7 = vld [vmem:[#allocation6 + $0x2] sm:$0x1]  ;;  %v626_v8 = vld [vmem:[#allocation6 + $0x3] sm:$0x1]  ;;  %v628_v9 = vld [vmem:[#allocation3 + $0x7] sm:$0x1] }
  0x2b   :  { %v630_v10 = vld [vmem:[#allocation3 + $0x8] sm:$0x1]  ;;  %v632_v11 = vld [vmem:[#allocation6 + $0x4] sm:$0x1]  ;;  %v634_v12 = vld [vmem:[#allocation6 + $0x6] sm:$0x1] }
  0x2c   :  { %v636_v13 = vld [vmem:[#allocation6 + $0x7] sm:$0x1]  ;;  %v94_v14 = vmul.f32 0.14285715, %v612_v1  ;;  %v95_v15 = vmul.f32 0.14285715, %v614_v2 }
  0x2d   :  { %v96_v16 = vmul.f32 0.14285715, %v620_v5  ;;  %v97_v17 = vmul.f32 0.14285715, %v624_v7  ;;  %v98_v18 = vmul.f32 0.5, %v616_v3  ;;  %v100_v19 = vmul.f32 0.5, %v618_v4 }
  0x2e   :  { %v104_v20 = vmul.f32 0.5, %v626_v8  ;;  %v106_v21 = vmul.f32 0.5, %v632_v11  ;;  %v138_v22 = vmul.f32 0.14285715, %v622_v6  ;;  %v139_v23 = vmul.f32 0.14285715, %v628_v9 }
  0x2f   :  { %v142_v24 = vmul.f32 0.5, %v630_v10  ;;  %v99_v25 = vsub.f32 %v94_v14, %v98_v18  ;;  %v101_v26 = vsub.f32 %v95_v15, %v100_v19  ;;  %v102_v27 = vadd.f32 %v98_v18, %v94_v14  ;;  %v651_v37 = vld [vmem:[#allocation3 + $0x9] sm:$0x1]  ;;  %v653_v38 = vld [vmem:[#allocation6 + $0x8] sm:$0x1]  ;;  %s568_s1 = smov [#allocation8]  }
  0x30   :  { %v103_v28 = vadd.f32 %v100_v19, %v95_v15  ;;  %v105_v29 = vsub.f32 %v96_v16, %v104_v20  ;;  %v107_v30 = vsub.f32 %v97_v17, %v106_v21  ;;  %v108_v31 = vadd.f32 %v104_v20, %v96_v16  ;;  %v655_v39 = vld [vmem:[#allocation6 + $0x9] sm:$0x1]  ;;  %v241_v44 = vld [vmem:[#allocation6 + $0xa] sm:$0x1]  ;;  %v243_v45 = vld [vmem:[#allocation3 + $0xa] sm:$0x1] }
  0x31   :  { %v109_v32 = vadd.f32 %v106_v21, %v97_v17  ;;  %v124_v33 = vsub.f32 %v102_v27, %v99_v25  ;;  %v140_v35 = vmul.f32 0.14285715, %v634_v12  ;;  %v141_v36 = vmul.f32 0.14285715, %v636_v13  ;;  %v248_v20 = vld [vmem:[#allocation6 + $0xb] sm:$0x1] }
  0x32   :  { %v125_v34 = vsub.f32 %v103_v28, %v101_v26  ;;  %vm110_vm0 = vcmp.lt.f32.partialorder %v102_v27, %v105_v29  ;;  %vm111_vm1 = vcmp.gt.f32.partialorder %v99_v25, %v108_v31  ;;  %vm113_vm2 = vcmp.lt.f32.partialorder %v103_v28, %v107_v30  ;;  %s459_s6 = sshll.u32 %s568_s1, 4  ;;  %s460_s6 = int_to_ptr.vmem [resolvable:$true] %s459_s6 }
  0x33   :  { %vm115_vm3 = vcmp.gt.f32.partialorder %v101_v26, %v109_v32  ;;  %vm112_vm4 = vmor %vm110_vm0, %vm111_vm1  ;;  %v120_v40 = vmax.f32 %v99_v25, %v105_v29  ;;  %v121_v41 = vmax.f32 %v101_v26, %v107_v30  ;;  %v122_v42 = vmin.f32 %v102_v27, %v108_v31  ;;  %v257_v25 = vld [vmem:[#allocation3 + $0xc] sm:$0x1]  ;;  %v262_v27 = vld [vmem:[#allocation6 + $0xd] sm:$0x1]  ;;  %s534_s7 = scalar_lea.vmem %s460_s6, 16  ;;  %s538_s8 = scalar_lea.vmem %s460_s6, 32 }
  0x34   :  { %v123_v43 = vmin.f32 %v103_v28, %v109_v32  ;;  %vm114_vm5 = vmor %vm112_vm4, %vm113_vm2  ;;  %v126_v46 = vmul.f32 %v125_v34, %v124_v33  ;;  %v127_v47 = vsub.f32 %v108_v31, %v105_v29  ;;  %v128_v48 = vsub.f32 %v109_v32, %v107_v30  ;;  %v264_v28 = vld [vmem:[#allocation3 + $0xd] sm:$0x1]  ;;  %v269_v33 = vld [vmem:[#allocation6 + $0xe] sm:$0x1]  ;;  %p535_p2 = scmp.ne.s32.totalorder %s460_s6, %s534_s7  ;;  %p539_p3 = scmp.lt.s32.totalorder %s460_s6, %s460_s6 }
  0x35   :  { %v143_v49 = vsub.f32 %v138_v22, %v142_v24  ;;  %vm116_vm6 = vmor %vm114_vm5, %vm115_vm3  ;;  %v130_v50 = vsub.f32 %v122_v42, %v120_v40  ;;  %v144_v52 = vmul.f32 0.5, %v651_v37  ;;  %v146_v53 = vadd.f32 %v142_v24, %v138_v22  ;;  %v250_v22 = vld [vmem:[#allocation3 + $0xb] sm:$0x1]  ;;  %v255_v24 = vld [vmem:[#allocation6 + $0xc] sm:$0x1]  ;;  %p540_p4 = scmp.lt.s32.totalorder %s538_s8, %s534_s7 }
  0x36   :  { %v131_v51 = vsub.f32 %v123_v43, %v121_v41  ;;  %vm117_vm8 = vmxor %vm116_vm6, %vm567_vm7  ;;  %v129_v54 = vmul.f32 %v128_v48, %v127_v47  ;;  %v148_v55 = vmul.f32 0.5, %v653_v38  ;;  %v150_v56 = vmul.f32 0.5, %v655_v39  ;;  %v271_v34 = vld [vmem:[#allocation3 + $0xe] sm:$0x1]  ;;  %v278_v47 = vld [vmem:[#allocation3 + $0xf] sm:$0x1] }
  0x37   :  { %v244_v57 = vsub.f32 %v241_v44, %v243_v45  ;;  %v469_v58 = vsel %vm117_vm8, 1.0, %v566_v0  ;;  %v145_v60 = vsub.f32 %v139_v23, %v144_v52  ;;  %v147_v61 = vadd.f32 %v144_v52, %v139_v23  ;;  %p541_p5 = por %p540_p4, %p539_p3 }
  0x38   :  { %v132_v59 = vmul.f32 %v131_v51, %v130_v50  ;;  %v134_v62 = vadd.f32 %v129_v54, %v126_v46  ;;  %v149_v63 = vsub.f32 %v140_v35, %v148_v55  ;;  %v151_v14 = vsub.f32 %v141_v36, %v150_v56  ;;  %v276_v46 = vld [vmem:[#allocation6 + $0xf] sm:$0x1]  ;;  %v283_v54 = vld [vmem:[#allocation6 + $0x10] sm:$0x1] }
  0x39   :  { %v152_v15 = vadd.f32 %v148_v55, %v140_v35  ;;  %v153_v17 = vadd.f32 %v150_v56, %v141_v36  ;;  %v168_v18 = vsub.f32 %v146_v53, %v143_v49  ;;  %v169_v19 = vsub.f32 %v147_v61, %v145_v60  ;;  %v285_v55 = vld [vmem:[#allocation3 + $0x10] sm:$0x1]  ;;  %p542_p6 = pnand %p541_p5, %p535_p2 }
  0x3a   :  { %v662_v16 = vmul.f32 %v469_v58, %v132_v59  ;;  %vm154_vm9 = vcmp.lt.f32.partialorder %v146_v53, %v149_v63  ;;  %vm157_vm11 = vcmp.lt.f32.partialorder %v147_v61, %v151_v14  ;;  %v164_v21 = vmax.f32 %v143_v49, %v149_v63 }
  0x3b   :  { %vm155_vm10 = vcmp.gt.f32.partialorder %v143_v49, %v152_v15  ;;  %vm159_vm13 = vcmp.gt.f32.partialorder %v145_v60, %v153_v17  ;;  %v165_v23 = vmax.f32 %v145_v60, %v151_v14  ;;  %v166_v26 = vmin.f32 %v146_v53, %v152_v15  ;;  %v290_v60 = vld [vmem:[#allocation6 + $0x11] sm:$0x1] }
  0x3c   :  { %vm156_vm12 = vmor %vm154_vm9, %vm155_vm10  ;;  %v167_v29 = vmin.f32 %v147_v61, %v153_v17  ;;  %v170_v30 = vmul.f32 %v169_v19, %v168_v18  ;;  %v171_v31 = vsub.f32 %v152_v15, %v149_v63  ;;  %v172_v32 = vsub.f32 %v153_v17, %v151_v14  ;;  %v292_v61 = vld [vmem:[#allocation3 + $0x11] sm:$0x1]  ;;  %v297_v17 = vld [vmem:[#allocation6 + $0x12] sm:$0x1] }
  0x3d   :  { %vm158_vm14 = vmor %vm156_vm12, %vm157_vm11  ;;  %v135_v35 = vsub.f32 %v134_v62, %v662_v16  ;;  %v174_v36 = vsub.f32 %v166_v26, %v164_v21  ;;  %v245_v40 = vmul.f32 %v244_v57, %v244_v57  ;;  %v251_v41 = vsub.f32 %v248_v20, %v250_v22 }
  0x3e   :  { %vm160_vm15 = vmor %vm158_vm14, %vm159_vm13  ;;  %v173_v42 = vmul.f32 %v172_v32, %v171_v31  ;;  %v175_v43 = vsub.f32 %v167_v29, %v165_v23  ;;  %v258_v44 = vsub.f32 %v255_v24, %v257_v25  ;;  %v265_v45 = vsub.f32 %v262_v27, %v264_v28  ;;  %v304_v25 = vld [vmem:[#allocation6 + $0x13] sm:$0x1]  ;;  %v306_v23 = vld [vmem:[#allocation3 + $0x13] sm:$0x1] }
  0x3f   :  { %vm161_vm0 = vmxor %vm160_vm15, %vm567_vm7  ;;  %v252_v49 = vmul.f32 %v251_v41, %v251_v41  ;;  %v272_v50 = vsub.f32 %v269_v33, %v271_v34  ;;  %v279_v58 = vsub.f32 %v276_v46, %v278_v47  ;;  %478 = vrcp.f32 %v135_v35  ;;  %v667_v28 = vld [vmem:[#allocation6] sm:$0x1]  ;;  %v311_v29 = vld [vmem:[#allocation6 + $0x14] sm:$0x1] }
  0x40   :  { %v470_v48 = vsel %vm161_vm0, 1.0, %v566_v0  ;;  %v176_v51 = vmul.f32 %v175_v43, %v174_v36  ;;  %v178_v52 = vadd.f32 %v173_v42, %v170_v30  ;;  %v259_v53 = vmul.f32 %v258_v44, %v258_v44  ;;  %v299_v0 = vld [vmem:[#allocation3 + $0x12] sm:$0x1]  ;;  %v313_v30 = vld [vmem:[#allocation3 + $0x14] sm:$0x1] }
  0x41   :  { %v253_v56 = vadd.f32 %v252_v49, %v245_v40  ;;  %v266_v57 = vmul.f32 %v265_v45, %v265_v45  ;;  %v273_v63 = vmul.f32 %v272_v50, %v272_v50  ;;  %v286_v14 = vsub.f32 %v283_v54, %v285_v55  ;;  %v318_v34 = vld [vmem:[#allocation6 + $0x15] sm:$0x1]  ;;  %v320_v35 = vld [vmem:[#allocation3 + $0x15] sm:$0x1]  ;;  %v325_v42 = vld [vmem:[#allocation6 + $0x16] sm:$0x1] }
  0x42   :  { %v177_v59 = vmul.f32 %v470_v48, %v176_v51  ;;  %v280_v19 = vmul.f32 %v279_v58, %v279_v58  ;;  %v293_v20 = vsub.f32 %v290_v60, %v292_v61  ;;  %v300_v24 = vsub.f32 %v297_v17, %v299_v0  ;;  %v327_v44 = vld [vmem:[#allocation3 + $0x16] sm:$0x1]  ;;  %v332_v45 = vld [vmem:[#allocation6 + $0x17] sm:$0x1]  ;;  %v334_v46 = vld [vmem:[#allocation3 + $0x17] sm:$0x1] }
  0x43   :  { %v260_v62 = vadd.f32 %v259_v53, %v253_v56  ;;  %v287_v22 = vmul.f32 %v286_v14, %v286_v14  ;;  %v307_v33 = vsub.f32 %v304_v25, %v306_v23  ;;  %vm57_vm1 = vcmp.eq.f32.partialorder %v667_v28, 1.0  ;;  %v339_v50 = vld [vmem:[#allocation6 + $0x18] sm:$0x1]  ;;  %v673_v51 = vld [vmem:[#allocation3] sm:$0x1] }
  0x44   :  { %v179_v15 = vsub.f32 %v178_v52, %v177_v59  ;;  %v294_v27 = vmul.f32 %v293_v20, %v293_v20  ;;  %v301_v32 = vmul.f32 %v300_v24, %v300_v24  ;;  %v314_v41 = vsub.f32 %v311_v29, %v313_v30  ;;  %v675_v52 = vld [vmem:[#allocation3 + $0x5] sm:$0x1]  ;;  %v341_v54 = vld [vmem:[#allocation3 + $0x18] sm:$0x1]  ;;  %v346_v55 = vld [vmem:[#allocation6 + $0x19] sm:$0x1] }
  0x45   :  { %v267_v18 = vadd.f32 %v266_v57, %v260_v62  ;;  %v321_v43 = vsub.f32 %v318_v34, %v320_v35  ;;  %v308_v49 = vmul.f32 %v307_v33, %v307_v33  ;;  %v348_v56 = vld [vmem:[#allocation3 + $0x19] sm:$0x1]  ;;  %v353_v60 = vld [vmem:[#allocation6 + $0x1a] sm:$0x1]  ;;  %v355_v61 = vld [vmem:[#allocation3 + $0x1a] sm:$0x1]  ;;  %v328_v14 = vsub.f32 %v325_v42, %v327_v44 }
  0x46   :  { %480 = vrcp.f32 %v179_v15  ;;  %v315_v58 = vmul.f32 %v314_v41, %v314_v41  ;;  %v360_v62 = vld [vmem:[#allocation6 + $0x1b] sm:$0x1]  ;;  %v367_v15 = vld [vmem:[#allocation6 + $0x1c] sm:$0x1]  ;;  %v369_v17 = vld [vmem:[#allocation3 + $0x1c] sm:$0x1]  ;;  %v386_v0 = vmul.f32 %v673_v51, %v673_v51  ;;  %v335_v20 = vsub.f32 %v332_v45, %v334_v46 }
  0x47   :  { %v274_v21 = vadd.f32 %v273_v63, %v267_v18  ;;  %v322_v63 = vmul.f32 %v321_v43, %v321_v43  ;;  %v387_v18 = vmul.f32 %v675_v52, %v675_v52  ;;  %v349_v25 = vsub.f32 %v346_v55, %v348_v56 }
  0x48   :  { %v356_v23 = vsub.f32 %v353_v60, %v355_v61  ;;  %v370_v30 = vsub.f32 %v367_v15, %v369_v17  ;;  %vm410_vm11 = vcmask 1040384  }
  0x49   :  { %v281_v26 = vadd.f32 %v280_v19, %v274_v21  ;;  %v479_v36 = vpop.eup %478  ;;  %v342_v21 = vsub.f32 %v339_v50, %v341_v54  ;;  %v350_v34 = vmul.f32 %v349_v25, %v349_v25 }
  0x4a   :  { %v671_v47 = vmul.f32 %v479_v36, %v662_v16  ;;  %v362_v16 = vld [vmem:[#allocation3 + $0x1b] sm:$0x1]  ;;  %v357_v35 = vmul.f32 %v356_v23, %v356_v23  ;;  %v728_v42 = vmul.f32 %v370_v30, %v370_v30 }
  0x4b   :  { %v288_v31 = vadd.f32 %v287_v22, %v281_v26  ;;  %v363_v29 = vsub.f32 %v360_v62, %v362_v16  ;;  %v343_v33 = vmul.f32 %v342_v21, %v342_v21 }
  0x4d   :  { %v295_v40 = vadd.f32 %v294_v27, %v288_v31  ;;  %v329_v31 = vmul.f32 %v328_v14, %v328_v14  ;;  %v721_v36 = vmul.f32 %v363_v29, %v363_v29 }
  0x4f   :  { %v302_v48 = vadd.f32 %v301_v32, %v295_v40  ;;  %v336_v32 = vmul.f32 %v335_v20, %v335_v20 }
  0x50   :  { %v481_v53 = vpop.eup %480 }
  0x51   :  { %v181_v57 = vmul.f32 %v481_v53, %v177_v59  ;;  %v309_v59 = vadd.f32 %v308_v49, %v302_v48 }
  0x53   :  { %vm682_vm2 = vcmp.ge.f32.partialorder %v671_v47, %v181_v57 }
  0x54   :  { %v187_v22 = vsel %vm682_vm2, %v616_v3, %v630_v10  ;;  %v188_v24 = vsel %vm682_vm2, %v618_v4, %v651_v37  ;;  %v191_v26 = vsel %vm682_vm2, %v626_v8, %v653_v38  ;;  %v192_v27 = vsel %vm682_vm2, %v632_v11, %v655_v39  ;;  %v374_v3 = vld [vmem:[#allocation6 + $0x1d] sm:$0x1]  ;;  %v376_v8 = vld [vmem:[#allocation3 + $0x1d] sm:$0x1] }
  0x55   :  { %v704_v10 = vsel %vm57_vm1, %v187_v22, 0.0  ;;  %v708_v4 = vsel %vm57_vm1, %v188_v24, 0.0  ;;  %v712_v37 = vsel %vm57_vm1, %v191_v26, 0.0  ;;  %v388_v38 = vadd.f32 %v387_v18, %v386_v0  ;;  %v403_v18 = vld [vmem:[#allocation2 + $0x3] sm:$0x1] }
  0x56   :  { %482 = vrsqrt.f32 %v704_v10  ;;  %v717_v11 = vsel %vm57_vm1, %v192_v27, 0.0  ;;  %v316_v39 = vadd.f32 %v315_v58, %v309_v59  ;;  %v377_v40 = vsub.f32 %v374_v3, %v376_v8 }
  0x57   :  { %484 = vrsqrt.f32 %v708_v4  ;;  %v185_v41 = vsel %vm682_vm2, %v612_v1, %v622_v6  ;;  %v389_v43 = vsel %vm57_vm1, 0.0, %v388_v38  ;;  %v186_v44 = vsel %vm682_vm2, %v614_v2, %v628_v9 }
  0x58   :  { %486 = vrsqrt.f32 %v712_v37  ;;  %v189_v45 = vsel %vm682_vm2, %v620_v5, %v634_v12  ;;  %v323_v46 = vadd.f32 %v322_v63, %v316_v39  ;;  %v183_v1 = vsel %vm682_vm2, %v673_v51, %v675_v52 }
  0x59   :  { %488 = vrsqrt.f32 %v717_v11  ;;  %v190_v6 = vsel %vm682_vm2, %v624_v7, %v636_v13  ;;  %v184_v2 = vsel %vm682_vm2, %v671_v47, %v181_v57  ;;  %v381_v5 = vsel %vm682_vm2, %v675_v52, %v673_v51 }
  0x5a   :  { %v382_v9 = vsel %vm682_vm2, %v181_v57, %v671_v47  ;;  %vm196_vm3 = vcmp.eq.f32.partialorder %v704_v10, inf  ;;  %vm198_vm4 = vcmp.eq.f32.partialorder %v704_v10, 0.0  ;;  %v330_v12 = vadd.f32 %v329_v31, %v323_v46  ;;  %v391_v47 = vld [vmem:[#allocation2] sm:$0x1] }
  0x5b   :  { %v225_v48 = vsub.f32 %v184_v2, %v183_v1  ;;  %v199_v7 = vand.u32 2147483648, %v704_v10  ;;  %vm204_vm5 = vcmp.eq.f32.partialorder %v708_v4, inf  ;;  %vm206_vm6 = vcmp.eq.f32.partialorder %v708_v4, 0.0 }
  0x5c   :  { %v383_v13 = vsub.f32 %v382_v9, %v381_v5  ;;  %v207_v49 = vand.u32 2147483648, %v708_v4  ;;  %vm212_vm7 = vcmp.eq.f32.partialorder %v712_v37, inf  ;;  %v337_v50 = vadd.f32 %v336_v32, %v330_v12 }
  0x5d   :  { %v226_v51 = vmul.f32 %v225_v48, %v225_v48  ;;  %vm214_vm8 = vcmp.eq.f32.partialorder %v712_v37, 0.0  ;;  %v228_v52 = vsub.f32 %v189_v45, %v185_v41  ;;  %v230_v53 = vsub.f32 %v190_v6, %v186_v44  ;;  %v399_v41 = vld [vmem:[#allocation2 + $0x2] sm:$0x1] }
  0x5e   :  { %v384_v54 = vmul.f32 %v383_v13, %v383_v13  ;;  %v215_v56 = vand.u32 2147483648, %v712_v37  ;;  %vm220_vm9 = vcmp.eq.f32.partialorder %v717_v11, inf  ;;  %v344_v57 = vadd.f32 %v343_v33, %v337_v50 }
  0x5f   :  { %v227_v58 = vsel %vm57_vm1, %v226_v51, 0.0  ;;  %vm222_vm10 = vcmp.eq.f32.partialorder %v717_v11, 0.0  ;;  %v223_v15 = vand.u32 2147483648, %v717_v11  ;;  %v229_v21 = vmul.f32 %v228_v52, %v228_v52 }
  0x60   :  { %v483_v55 = vpop.eup %482  ;;  %v392_v62 = vadd.f32 %v391_v47, %v227_v58  ;;  %v385_v63 = vsel %vm57_vm1, %v384_v54, 0.0  ;;  %v351_v17 = vadd.f32 %v350_v34, %v344_v57  ;;  %v231_v22 = vmul.f32 %v230_v53, %v230_v53 }
  0x61   :  { %v485_v60 = vpop.eup %484  ;;  %v195_v61 = vmul.f32 %v483_v55, %v704_v10  ;;  %v390_v0 = vadd.f32 %v389_v43, %v385_v63  ;;  %v378_v38 = vmul.f32 %v377_v40, %v377_v40  ;;  %v435_v13 = vlaneseq }
  0x62   :  { %v487_v14 = vpop.eup %486  ;;  %v203_v16 = vmul.f32 %v485_v60, %v708_v4  ;;  %393 = vst [vmem:[#allocation2] sm:$0x1] %v392_v62  ;;  %v358_v26 = vadd.f32 %v357_v35, %v351_v17 }
  0x63   :  { %v489_v19 = vpop.eup %488  ;;  %v197_v59 = vsel %vm196_vm3, %v704_v10, %v195_v61  ;;  %v211_v20 = vmul.f32 %v487_v14, %v712_v37  ;;  %v404_v30 = vadd.f32 %v403_v18, %v390_v0  ;;  %v436_v51 = vand.u32 127, %v435_v13 }
  0x64   :  { %v200_v24 = vsel %vm198_vm4, %v199_v7, %v197_v59  ;;  %v205_v25 = vsel %vm204_vm5, %v708_v4, %v203_v16  ;;  %v219_v23 = vmul.f32 %v489_v19, %v717_v11  ;;  %v365_v8 = vadd.f32 %v721_v36, %v358_v26  ;;  %v395_v36 = vld [vmem:[#allocation2 + $0x1] sm:$0x1] }
  0x65   :  { %v208_v27 = vsel %vm206_vm6, %v207_v49, %v205_v25  ;;  %v213_v29 = vsel %vm212_vm7, %v712_v37, %v211_v20  ;;  %v232_v4 = vadd.f32 %v231_v22, %v229_v21  ;;  %405 = vst [vmem:[#allocation2 + $0x3] sm:$0x1] %v404_v30  ;;  %vm439_vm12 = vcmp.eq.s32.totalorder %v436_v51, 1 }
  0x66   :  { %v216_v3 = vsel %vm214_vm8, %v215_v56, %v213_v29  ;;  %v221_v10 = vsel %vm220_vm9, %v717_v11, %v219_v23  ;;  %v372_v33 = vadd.f32 %v728_v42, %v365_v8  ;;  %vm437_vm13 = vcmp.eq.s32.totalorder %v436_v51, 0 }
  0x67   :  { %v224_v39 = vsel %vm222_vm10, %v223_v15, %v221_v10  ;;  %v233_v31 = vsub.f32 %v216_v3, %v200_v24  ;;  %vm442_vm14 = vcmp.eq.s32.totalorder %v436_v51, 2  ;;  %vm445_vm15 = vcmp.eq.s32.totalorder %v436_v51, 3 }
  0x68   :  { %v236_v32 = vsub.f32 %v224_v39, %v208_v27  ;;  %v379_v37 = vadd.f32 %v378_v38, %v372_v33  ;;  %vm448_vm0 = vcmp.eq.s32.totalorder %v436_v51, 4 }
  0x69   :  { %v234_v34 = vmul.f32 %v233_v31, %v233_v31  ;;  %v409_v5 = vld [vmem:[#allocation2] sm:$0x1] }
  0x6a   :  { %v237_v35 = vmul.f32 %v236_v32, %v236_v32  ;;  %v380_v44 = vsel %vm57_vm1, %v379_v37, 0.0  ;;  %v411_v48 = vsel %vm410_vm11, %v409_v5, 0.0 }
  0x6b   :  { %v235_v43 = vadd.f32 %v234_v34, %v232_v4  ;;  %v400_v40 = vadd.f32 %v399_v41, %v380_v44 }
  0x6c   :  { %v426_v42 = vld [vmem:[#allocation2 + $0x3] sm:$0x1] }
  0x6d   :  { %v238_v45 = vadd.f32 %v237_v35, %v235_v43  ;;  %401 = vst [vmem:[#allocation2 + $0x2] sm:$0x1] %v400_v40  ;;  %v427_v9 = vsel %vm410_vm11, %v426_v42, 0.0 }
  0x6f   :  { %v239_v11 = vsel %vm57_vm1, %v238_v45, 0.0 }
  0x70   :  { %v396_v46 = vadd.f32 %v395_v36, %v239_v11 }
  0x72   :  { %397 = vst [vmem:[#allocation2 + $0x1] sm:$0x1] %v396_v46 }
  0x74   :  { %v421_v1 = vld [vmem:[#allocation2 + $0x2] sm:$0x1] }
  0x75   :  { %v422_v6 = vsel %vm410_vm11, %v421_v1, 0.0 }
  0x76   :  { %423 = vadd.xlane.f32.xlu1 %v422_v6 }
  0x79   :  { %v415_v2 = vld [vmem:[#allocation2 + $0x1] sm:$0x1] }
  0x7a   :  { %v416_v12 = vsel %vm410_vm11, %v415_v2, 0.0  ;;  %428 = vadd.xlane.f32.xlu1 %v427_v9 }
  0x7b   :  { %417 = vadd.xlane.f32.xlu0 %v416_v12 }
  0x7f   :  { %412 = vadd.xlane.f32.xlu0 %v411_v48 }
 0x103   :  { %v424_v7 = vpop.xlane.xlu1 %423 }
 0x104   :  { %v440_v56 = vsel %vm439_vm12, %v424_v7, 0.0 }
 0x107   :  { %v429_v49 = vpop.xlane.xlu1 %428 }
 0x108   :  { %v418_v28 = vpop.xlane.xlu0 %417  ;;  %v431_v53 = vmul.f32 0.5, %v429_v49 }
 0x109   :  { %v420_v50 = vmul.f32 5.0, %v418_v28 }
 0x10a   :  { %v449_v14 = vsel %vm448_vm0, %v431_v53, 0.0 }
 0x10b   :  { %v446_v62 = vsel %vm445_vm15, %v420_v50, 0.0 }
 0x10c   :  { %v413_v47 = vpop.xlane.xlu0 %412 }
 0x10d   :  { %v432_v52 = vadd.f32 %v420_v50, %v413_v47  ;;  %v443_v60 = vsel %vm442_vm14, %v413_v47, 0.0 }
 0x10f   :  { %v433_v54 = vadd.f32 %v432_v52, %v424_v7 }
 0x111   :  { %v434_v55 = vadd.f32 %v433_v54, %v431_v53 }
 0x113   :  { %v438_v57 = vsel %vm437_vm13, %v434_v55, 0.0 }
 0x114   :  { %v441_v58 = vadd.f32 %v440_v56, %v438_v57 }
 0x116   :  { %v444_v61 = vadd.f32 %v443_v60, %v441_v58 }
 0x118   :  { %v447_v63 = vadd.f32 %v446_v62, %v444_v61 }
 0x11a   :  { %v450_v16 = vadd.f32 %v449_v14, %v447_v63 }
 0x11c   :  { %v451_v15 = vmul.f32 0.5, %v450_v16 }
 0x11e   :  { %452 = vst [vmem:[#allocation8] sm:$0x1] %v451_v15 }
 0x11f   :  { %545 = shalt.err (!%p542_p6)
}
 0x120   :  { %s546_s11 = scalar_lea.hbm %s818_s2, 16 }
 0x121   :  { %p547_p7 = scmp.ne.s32.totalorder %s818_s2, %s546_s11  ;;  %p550_p8 = scmp.lt.u32.totalorder %s546_s11, %s818_s2 }
 0x123   :  { %p552_p9 = pnand %p550_p8, %p547_p7 }
 0x125   :  { %555 = shalt.err (!%p552_p9)
}
 0x126   :  { %462 = dma.vmem_to_hbm [thread:$0]  %s460_s6, 16, %s818_s2, [#allocation5]  }
 0x127   :  { %560 = dma.done.wait [#allocation5], 16  }
 0x128   :  { %561 = vsyncadd [#allocation5], 4294967280 }
 0x129   :  { %466 = vsyncpa [#allocation4], 1 }
 0x12a   :  { %467 = vsyncpa [#allocation7], 1 }
 0x12b   :  { %468 = vsyncpa [#allocation5], 1 }

</bundles_post_ra>
